<compile_context>
chip_gen: v5e
topology: v5e:2x2
jax: 0.10.0
libtpu: 0.0.40
codegen_flags: <defaults>
</compile_context>

<pallas_src>
import jax
import jax.numpy as jnp
from jax.experimental import pallas as pl
from jax.experimental.pallas import tpu as pltpu


def ae_forward_kernel(x_ref,
                      w1_ref, b1_ref, w2_ref, b2_ref,
                      w3_ref, b3_ref, w4_ref, b4_ref,
                      out_ref):
    """One (TM, D) batch tile of the full encode->decode pipeline.

    x_ref:   [TM, D]  f32 flattened input tile
    w1..w4:  bf16 weights (D,H) (H,Z) (Z,H) (H,D), resident in VMEM
    b1..b4:  f32 biases (1,H) (1,Z) (1,H) (1,D), resident in VMEM
    out_ref: [TM, D]  f32 reconstruction tile
    """
    x = x_ref[...]

    # ----- encoder -----
    h1 = jnp.dot(x.astype(jnp.bfloat16), w1_ref[...],
                 preferred_element_type=jnp.float32) + b1_ref[...]
    h1 = jnp.maximum(h1, 0.0)
    z = jnp.dot(h1.astype(jnp.bfloat16), w2_ref[...],
                preferred_element_type=jnp.float32) + b2_ref[...]

    # ----- decoder -----
    h2 = jnp.dot(z.astype(jnp.bfloat16), w3_ref[...],
                 preferred_element_type=jnp.float32) + b3_ref[...]
    h2 = jnp.maximum(h2, 0.0)
    out_ref[...] = jnp.dot(h2.astype(jnp.bfloat16), w4_ref[...],
                           preferred_element_type=jnp.float32) + b4_ref[...]


def ae_forward(x_nchw, params, *, tm=128):
    """NCHW -> flatten -> batch-tiled Pallas kernel -> NCHW reconstruction."""
    N, C, H, W = x_nchw.shape
    D = C * H * W
    x_flat = x_nchw.reshape(N, D).astype(jnp.float32)

    # Pad batch to a multiple of the tile so every MXU call sees a dense M.
    n_pad = pl.cdiv(N, tm) * tm
    if n_pad != N:
        x_flat = jnp.pad(x_flat, ((0, n_pad - N), (0, 0)))

    w1, b1, w2, b2, w3, b3, w4, b4 = params
    HID = w1.shape[1]
    Z = w2.shape[1]

    # bf16 weights: half the weight DMA bytes + native bf16 MXU on v6e/v7x.
    w1b, w2b, w3b, w4b = (w.astype(jnp.bfloat16) for w in (w1, w2, w3, w4))
    b1f, b2f, b3f, b4f = (b.astype(jnp.float32) for b in (b1, b2, b3, b4))

    grid = (n_pad // tm,)
    # Weight/bias BlockSpecs always map to block (0, 0): whole array, resident
    # across all batch tiles (no re-DMA per grid step). x/out tiles are
    # double-buffered by the Pallas pipeline.
    # TODO(synk): for large D*H (non-toy image AEs) stream w1/w4 over a K/N
    # grid axis instead of keeping them whole-array resident (v7x 64 MiB VMEM).
    recon_flat = pl.pallas_call(
        ae_forward_kernel,
        out_shape=jax.ShapeDtypeStruct((n_pad, D), jnp.float32),
        grid_spec=pltpu.PrefetchScalarGridSpec(
            num_scalar_prefetch=0,
            grid=grid,
            in_specs=[
                pl.BlockSpec((tm, D), lambda i: (i, 0)),     # x tile
                pl.BlockSpec((D, HID), lambda i: (0, 0)),    # w1
                pl.BlockSpec((1, HID), lambda i: (0, 0)),    # b1
                pl.BlockSpec((HID, Z), lambda i: (0, 0)),    # w2
                pl.BlockSpec((1, Z), lambda i: (0, 0)),      # b2
                pl.BlockSpec((Z, HID), lambda i: (0, 0)),    # w3
                pl.BlockSpec((1, HID), lambda i: (0, 0)),    # b3
                pl.BlockSpec((HID, D), lambda i: (0, 0)),    # w4
                pl.BlockSpec((1, D), lambda i: (0, 0)),      # b4
            ],
            out_specs=pl.BlockSpec((tm, D), lambda i: (i, 0)),
        ),
        compiler_params=pltpu.CompilerParams(
            dimension_semantics=("parallel",),   # shard batch tiles over 2 TCs (v7x)
        ),
    )(x_flat, w1b, b1f, w2b, b2f, w3b, b3f, w4b, b4f)

    return recon_flat[:N].reshape(N, C, H, W)


def init_params(key, d_in, d_hidden, d_latent):
    """Deterministic synthetic parameters (uniform fan-in scaling, like nn.Linear)."""
    ks = jax.random.split(key, 8)

    def lin(kw, kb, fan_in, fan_out):
        bound = 1.0 / jnp.sqrt(fan_in)
        w = jax.random.uniform(kw, (fan_in, fan_out), jnp.float32, -bound, bound)
        b = jax.random.uniform(kb, (1, fan_out), jnp.float32, -bound, bound)
        return w, b

    w1, b1 = lin(ks[0], ks[1], d_in, d_hidden)      # encoder L1
    w2, b2 = lin(ks[2], ks[3], d_hidden, d_latent)  # encoder L2
    w3, b3 = lin(ks[4], ks[5], d_latent, d_hidden)  # decoder L1
    w4, b4 = lin(ks[6], ks[7], d_hidden, d_in)      # decoder L2
    return (w1, b1, w2, b2, w3, b3, w4, b4)


def ae_forward_ref(x_nchw, params, weight_dtype=jnp.float32):
    """Pure-JAX reference. weight_dtype=bf16 mirrors the kernel's precision."""
    N, C, H, W = x_nchw.shape
    x = x_nchw.reshape(N, -1).astype(jnp.float32)
    w1, b1, w2, b2, w3, b3, w4, b4 = params

    def lin(a, w, b):
        return jnp.dot(a.astype(weight_dtype), w.astype(weight_dtype),
                       preferred_element_type=jnp.float32) + b

    h1 = jnp.maximum(lin(x, w1, b1), 0.0)
    z = lin(h1, w2, b2)
    h2 = jnp.maximum(lin(z, w3, b3), 0.0)
    recon = lin(h2, w4, b4)
    return recon.reshape(N, C, H, W)


if __name__ == "__main__":
    key = jax.random.PRNGKey(0)
    k_x, k_p = jax.random.split(key)

    # Small shapes consistent with an image autoencoder forward pass.
    N, C, H, W = 2, 4, 16, 16          # input: [2, 4, 16, 16] NCHW
    D = C * H * W                      # 1024
    HID, Z = 128, 128                  # lane-dense hidden / latent dims

    x = jax.random.uniform(k_x, (N, C, H, W), jnp.float32)
    params = init_params(k_p, D, HID, Z)

    recon = ae_forward(x, params)
    recon = jax.block_until_ready(recon)
    assert recon.shape == (N, C, H, W)

    # Primary check: matches a same-precision (bf16-weight, f32-accum) JAX ref.
    ref_bf16 = ae_forward_ref(x, params, weight_dtype=jnp.bfloat16)
    err_bf16 = float(jnp.max(jnp.abs(recon - ref_bf16)))
    assert jnp.allclose(recon, ref_bf16, atol=1e-2, rtol=1e-2), err_bf16

    # Informational: deviation from the full-f32 reference (bf16 weight effect).
    ref_f32 = ae_forward_ref(x, params, weight_dtype=jnp.float32)
    err_f32 = float(jnp.max(jnp.abs(recon - ref_f32)))
    assert err_f32 < 5e-2, err_f32

    print("KERNEL_OK")
</pallas_src>

<mosaic_0001>
module attributes {stable_mosaic.version = 11 : i64} {
  func.func @ae_forward_kernel(%arg0: i32, %arg1: memref<128x1024xf32, #tpu.memory_space<vmem>>, %arg2: memref<1024x128xbf16, #tpu.memory_space<vmem>>, %arg3: memref<1x128xf32, #tpu.memory_space<vmem>>, %arg4: memref<128x128xbf16, #tpu.memory_space<vmem>>, %arg5: memref<1x128xf32, #tpu.memory_space<vmem>>, %arg6: memref<128x128xbf16, #tpu.memory_space<vmem>>, %arg7: memref<1x128xf32, #tpu.memory_space<vmem>>, %arg8: memref<128x1024xbf16, #tpu.memory_space<vmem>>, %arg9: memref<1x1024xf32, #tpu.memory_space<vmem>>, %arg10: memref<128x1024xf32, #tpu.memory_space<vmem>>) attributes {dimension_semantics = [#tpu.dimension_semantics<parallel>], iteration_bounds = array<i64: 1>, scalar_prefetch = 0 : i64, scratch_operands = 0 : i64, tpu.core_type = #tpu.core_type<tc>, window_params = [{transform_indices = @transform_0, window_bounds = array<i64: 128, 1024>}, {pipeline_mode = #tpu.pipeline_mode<synchronous>, transform_indices = @transform_1, window_bounds = array<i64: 1024, 128>}, {pipeline_mode = #tpu.pipeline_mode<synchronous>, transform_indices = @transform_2, window_bounds = array<i64: 1, 128>}, {pipeline_mode = #tpu.pipeline_mode<synchronous>, transform_indices = @transform_3, window_bounds = array<i64: 128, 128>}, {pipeline_mode = #tpu.pipeline_mode<synchronous>, transform_indices = @transform_4, window_bounds = array<i64: 1, 128>}, {pipeline_mode = #tpu.pipeline_mode<synchronous>, transform_indices = @transform_5, window_bounds = array<i64: 128, 128>}, {pipeline_mode = #tpu.pipeline_mode<synchronous>, transform_indices = @transform_6, window_bounds = array<i64: 1, 128>}, {pipeline_mode = #tpu.pipeline_mode<synchronous>, transform_indices = @transform_7, window_bounds = array<i64: 128, 1024>}, {pipeline_mode = #tpu.pipeline_mode<synchronous>, transform_indices = @transform_8, window_bounds = array<i64: 1, 1024>}, {transform_indices = @transform_9, window_bounds = array<i64: 128, 1024>}]} {
    %c0 = arith.constant 0 : index
    %c0_0 = arith.constant 0 : index
    %0 = vector.load %arg1[%c0, %c0_0] : memref<128x1024xf32, #tpu.memory_space<vmem>>, vector<128x1024xf32>
    %1 = arith.truncf %0 : vector<128x1024xf32> to vector<128x1024xbf16>
    %c0_1 = arith.constant 0 : index
    %c0_2 = arith.constant 0 : index
    %2 = vector.load %arg2[%c0_1, %c0_2] : memref<1024x128xbf16, #tpu.memory_space<vmem>>, vector<1024x128xbf16>
    %cst = arith.constant dense<0.000000e+00> : vector<128x128xf32>
    %3 = tpu.matmul %1, %2, %cst {dimension_numbers = #tpu.dot_dimension_numbers<[1], [0], [0], [1], [0, 0, 1, 1], [], []>} : vector<128x1024xbf16>, vector<1024x128xbf16>, vector<128x128xf32> -> vector<128x128xf32>
    %c0_3 = arith.constant 0 : index
    %c0_4 = arith.constant 0 : index
    %4 = vector.load %arg3[%c0_3, %c0_4] : memref<1x128xf32, #tpu.memory_space<vmem>>, vector<1x128xf32>
    %5 = vector.broadcast %4 : vector<1x128xf32> to vector<128x128xf32>
    %6 = arith.addf %3, %5 : vector<128x128xf32>
    %cst_5 = arith.constant 0.000000e+00 : f32
    %7 = vector.broadcast %cst_5 : f32 to vector<128x128xf32>
    %8 = arith.maximumf %6, %7 : vector<128x128xf32>
    %9 = arith.truncf %8 : vector<128x128xf32> to vector<128x128xbf16>
    %c0_6 = arith.constant 0 : index
    %c0_7 = arith.constant 0 : index
    %10 = vector.load %arg4[%c0_6, %c0_7] : memref<128x128xbf16, #tpu.memory_space<vmem>>, vector<128x128xbf16>
    %cst_8 = arith.constant dense<0.000000e+00> : vector<128x128xf32>
    %11 = tpu.matmul %9, %10, %cst_8 {dimension_numbers = #tpu.dot_dimension_numbers<[1], [0], [0], [1], [0, 0, 1, 1], [], []>} : vector<128x128xbf16>, vector<128x128xbf16>, vector<128x128xf32> -> vector<128x128xf32>
    %c0_9 = arith.constant 0 : index
    %c0_10 = arith.constant 0 : index
    %12 = vector.load %arg5[%c0_9, %c0_10] : memref<1x128xf32, #tpu.memory_space<vmem>>, vector<1x128xf32>
    %13 = vector.broadcast %12 : vector<1x128xf32> to vector<128x128xf32>
    %14 = arith.addf %11, %13 : vector<128x128xf32>
    %15 = arith.truncf %14 : vector<128x128xf32> to vector<128x128xbf16>
    %c0_11 = arith.constant 0 : index
    %c0_12 = arith.constant 0 : index
    %16 = vector.load %arg6[%c0_11, %c0_12] : memref<128x128xbf16, #tpu.memory_space<vmem>>, vector<128x128xbf16>
    %cst_13 = arith.constant dense<0.000000e+00> : vector<128x128xf32>
    %17 = tpu.matmul %15, %16, %cst_13 {dimension_numbers = #tpu.dot_dimension_numbers<[1], [0], [0], [1], [0, 0, 1, 1], [], []>} : vector<128x128xbf16>, vector<128x128xbf16>, vector<128x128xf32> -> vector<128x128xf32>
    %c0_14 = arith.constant 0 : index
    %c0_15 = arith.constant 0 : index
    %18 = vector.load %arg7[%c0_14, %c0_15] : memref<1x128xf32, #tpu.memory_space<vmem>>, vector<1x128xf32>
    %19 = vector.broadcast %18 : vector<1x128xf32> to vector<128x128xf32>
    %20 = arith.addf %17, %19 : vector<128x128xf32>
    %cst_16 = arith.constant 0.000000e+00 : f32
    %21 = vector.broadcast %cst_16 : f32 to vector<128x128xf32>
    %22 = arith.maximumf %20, %21 : vector<128x128xf32>
    %23 = arith.truncf %22 : vector<128x128xf32> to vector<128x128xbf16>
    %c0_17 = arith.constant 0 : index
    %c0_18 = arith.constant 0 : index
    %24 = vector.load %arg8[%c0_17, %c0_18] : memref<128x1024xbf16, #tpu.memory_space<vmem>>, vector<128x1024xbf16>
    %cst_19 = arith.constant dense<0.000000e+00> : vector<128x1024xf32>
    %25 = tpu.matmul %23, %24, %cst_19 {dimension_numbers = #tpu.dot_dimension_numbers<[1], [0], [0], [1], [0, 0, 1, 1], [], []>} : vector<128x128xbf16>, vector<128x1024xbf16>, vector<128x1024xf32> -> vector<128x1024xf32>
    %c0_20 = arith.constant 0 : index
    %c0_21 = arith.constant 0 : index
    %26 = vector.load %arg9[%c0_20, %c0_21] : memref<1x1024xf32, #tpu.memory_space<vmem>>, vector<1x1024xf32>
    %27 = vector.broadcast %26 : vector<1x1024xf32> to vector<128x1024xf32>
    %28 = arith.addf %25, %27 : vector<128x1024xf32>
    %c0_22 = arith.constant 0 : index
    %c0_23 = arith.constant 0 : index
    %29 = vector.load %arg10[%c0_22, %c0_23] : memref<128x1024xf32, #tpu.memory_space<vmem>>, vector<128x1024xf32>
    tpu.vector_store %arg10[%c0_22, %c0_23], %28 {strides = array<i32>} : memref<128x1024xf32, #tpu.memory_space<vmem>>, vector<128x1024xf32>,
    return
  }
  func.func @transform_0(%arg0: i32) -> (i32, i32) {
    %c0_i32 = arith.constant 0 : i32
    %c0_i32_0 = arith.constant 0 : i32
    return %arg0, %c0_i32 : i32, i32
  }
  func.func @transform_1(%arg0: i32) -> (i32, i32) {
    %c0_i32 = arith.constant 0 : i32
    %c0_i32_0 = arith.constant 0 : i32
    %c0_i32_1 = arith.constant 0 : i32
    return %c0_i32, %c0_i32_0 : i32, i32
  }
  func.func @transform_2(%arg0: i32) -> (i32, i32) {
    %c0_i32 = arith.constant 0 : i32
    %c0_i32_0 = arith.constant 0 : i32
    %c0_i32_1 = arith.constant 0 : i32
    return %c0_i32, %c0_i32_0 : i32, i32
  }
  func.func @transform_3(%arg0: i32) -> (i32, i32) {
    %c0_i32 = arith.constant 0 : i32
    %c0_i32_0 = arith.constant 0 : i32
    %c0_i32_1 = arith.constant 0 : i32
    return %c0_i32, %c0_i32_0 : i32, i32
  }
  func.func @transform_4(%arg0: i32) -> (i32, i32) {
    %c0_i32 = arith.constant 0 : i32
    %c0_i32_0 = arith.constant 0 : i32
    %c0_i32_1 = arith.constant 0 : i32
    return %c0_i32, %c0_i32_0 : i32, i32
  }
  func.func @transform_5(%arg0: i32) -> (i32, i32) {
    %c0_i32 = arith.constant 0 : i32
    %c0_i32_0 = arith.constant 0 : i32
    %c0_i32_1 = arith.constant 0 : i32
    return %c0_i32, %c0_i32_0 : i32, i32
  }
  func.func @transform_6(%arg0: i32) -> (i32, i32) {
    %c0_i32 = arith.constant 0 : i32
    %c0_i32_0 = arith.constant 0 : i32
    %c0_i32_1 = arith.constant 0 : i32
    return %c0_i32, %c0_i32_0 : i32, i32
  }
  func.func @transform_7(%arg0: i32) -> (i32, i32) {
    %c0_i32 = arith.constant 0 : i32
    %c0_i32_0 = arith.constant 0 : i32
    %c0_i32_1 = arith.constant 0 : i32
    return %c0_i32, %c0_i32_0 : i32, i32
  }
  func.func @transform_8(%arg0: i32) -> (i32, i32) {
    %c0_i32 = arith.constant 0 : i32
    %c0_i32_0 = arith.constant 0 : i32
    %c0_i32_1 = arith.constant 0 : i32
    return %c0_i32, %c0_i32_0 : i32, i32
  }
  func.func @transform_9(%arg0: i32) -> (i32, i32) {
    %c0_i32 = arith.constant 0 : i32
    %c0_i32_0 = arith.constant 0 : i32
    return %arg0, %c0_i32 : i32, i32
  }
}

</mosaic_0001>

<bundles_post_ra>
// kernel: tpu_custom_call.1
= control target key start
LH: loop header
LB: loop body
LE: loop exit
PB: predicated region body
PF: predicated region fallthrough
CT: control target
= control target key end

     0   :  { %14 = vsyncpa [#allocation3], 0  ;;  %s3894_s0 = inlined_call_operand.hbm [shape: f32[128,1024], index: 0, kind: input, shape index: {}]   ;;  %s3895_s1 = inlined_call_operand.hbm [shape: bf16[1024,128], index: 1, kind: input, shape index: {}]   ;;  %s3896_s2 = inlined_call_operand.vmem [shape: f32[1,128], index: 2, kind: input, shape index: {}]   ;;  %s3897_s3 = inlined_call_operand.hbm [shape: bf16[128,128], index: 3, kind: input, shape index: {}]   ;;  %s3898_s4 = inlined_call_operand.vmem [shape: f32[1,128], index: 4, kind: input, shape index: {}]   ;;  %s3899_s5 = inlined_call_operand.hbm [shape: bf16[128,128], index: 5, kind: input, shape index: {}]   ;;  %s3900_s6 = inlined_call_operand.vmem [shape: f32[1,128], index: 6, kind: input, shape index: {}]   ;;  %s3901_s7 = inlined_call_operand.hbm [shape: bf16[128,1024], index: 7, kind: input, shape index: {}]   ;;  %s3902_s8 = inlined_call_operand.hbm [shape: f32[1,1024], index: 8, kind: input, shape index: {}]   ;;  %s3903_s9 = inlined_call_operand.hbm [shape: f32[128,1024], index: 9, kind: output, shape index: {}]  }
   0x1   :  { %15 = vsyncpa [#allocation6], 0 }
   0x2   :  { %16 = vsyncpa [#allocation9], 0 }
   0x3   :  { %17 = vsyncpa [#allocation12], 0  ;;  %s36_s11 = sshll.u32 %s3895_s1, 4  ;;  %s37_s11 = int_to_ptr.hbm [resolvable:$true] %s36_s11 }
   0x4   :  { %18 = vsyncpa [#allocation4], 0  ;;  %s3388_s12 = smov [#allocation5]   ;;  %s66_s16 = sshll.u32 %s3899_s5, 4  ;;  %s67_s16 = int_to_ptr.hbm [resolvable:$true] %s66_s16 }
   0x5   :  { %s38_s13 = sshll.u32 %s3388_s12, 4  ;;  %s3389_s17 = smov 64   ;;  %s39_s13 = int_to_ptr.vmem [resolvable:$true] %s38_s13 }
   0x6   :  { %s3390_s18 = smov 4   ;;  %s3391_s19 = smov [#allocation8]  }
   0x7   :  { %44 = dma.hbm_to_vmem [thread:$0]  %s37_s11, 8192, %s39_s13, [#allocation6], %s3389_s17, %s3389_s17, %s3390_s18  }
   0x8   :  { %s68_s20 = sshll.u32 %s3391_s19, 4  ;;  %s23_s1 = sshll.u32 %s3894_s0, 4  ;;  %s69_s20 = int_to_ptr.vmem [resolvable:$true] %s68_s20  ;;  %s24_s1 = int_to_ptr.hbm [resolvable:$true] %s23_s1 }
   0x9   :  { %74 = dma.hbm_to_vmem [thread:$0]  %s67_s16, 1024, %s69_s20, [#allocation9], %s3389_s17, %s3389_s17, %s3390_s18  }
   0xa   :  { %s3392_s23 = smov [#allocation2]   ;;  %s51_s26 = sshll.u32 %s3897_s3, 4  ;;  %s52_s26 = int_to_ptr.hbm [resolvable:$true] %s51_s26 }
   0xb   :  { %s25_s24 = sshll.u32 %s3392_s23, 4  ;;  %s3393_s27 = smov 1024   ;;  %s26_s24 = int_to_ptr.vmem [resolvable:$true] %s25_s24 }
   0xc   :  { %31 = dma.hbm_to_vmem [thread:$0]  %s24_s1, 16384, %s26_s24, [#allocation3], %s3393_s27, %s3393_s27, %s3389_s17  }
   0xd   :  { %s81_s29 = sshll.u32 %s3901_s7, 4  ;;  %s3394_s30 = smov [#allocation7]   ;;  %s82_s29 = int_to_ptr.hbm [resolvable:$true] %s81_s29 }
   0xe   :  { %s53_s10 = sshll.u32 %s3394_s30, 4  ;;  %s3395_s11 = smov [#allocation10]   ;;  %s54_s10 = int_to_ptr.vmem [resolvable:$true] %s53_s10 }
   0xf   :  { %59 = dma.hbm_to_vmem [thread:$0]  %s52_s26, 1024, %s54_s10, [#allocation6], %s3389_s17, %s3389_s17, %s3390_s18  }
  0x10   :  { %s83_s3 = sshll.u32 %s3395_s11, 4  ;;  %s3396_s12 = smov 512   ;;  %s84_s3 = int_to_ptr.vmem [resolvable:$true] %s83_s3 }
  0x11   :  { %s3397_s13 = smov 32   ;;  %s95_s16 = sshll.u32 %s3902_s8, 4  ;;  %s96_s16 = int_to_ptr.hbm [resolvable:$true] %s95_s16 }
  0x12   :  { %89 = dma.hbm_to_vmem [thread:$0]  %s82_s29, 8192, %s84_s3, [#allocation9], %s3396_s12, %s3396_s12, %s3397_s13  }
  0x13   :  { %s3398_s19 = smov [#allocation11]  }
  0x14   :  { %s97_s7 = sshll.u32 %s3398_s19, 4  ;;  %s98_s7 = int_to_ptr.vmem [resolvable:$true] %s97_s7 }
  0x15   :  { %100 = dma.hbm_to_vmem [thread:$0]  %s96_s16, 128, %s98_s7, [#allocation12]  }
  0x16   :  { %3378 = dma.done.wait [#allocation3], 16384  }
  0x17   :  { %3379 = vsyncadd [#allocation3], 4294950912 }
  0x18   :  { %3380 = dma.done.wait [#allocation6], 9216  }
  0x19   :  { %3381 = vsyncadd [#allocation6], 4294958080 }
  0x1a   :  { %3382 = dma.done.wait [#allocation9], 9216  }
  0x1b   :  { %3383 = vsyncadd [#allocation9], 4294958080 }
  0x1c   :  { %3384 = dma.done.wait [#allocation12], 128  }
  0x1d   :  { %3385 = vsyncadd [#allocation12], 4294967168  ;;  %v3042_v0 = vld [vmem:[#allocation5 + $0x38] sm:$0xff]  ;;  %v3041_v2 = vld [vmem:[#allocation5 + $0x30] sm:$0xff]  ;;  %s2443_s24 = sshll.u32 %s3903_s9, 4  ;;  %s2444_s24 = int_to_ptr.hbm [resolvable:$true] %s2443_s24 }
  0x1e   :  { %v3050_v1 = vld [vmem:[#allocation5 + $0x78] sm:$0xff]  ;;  %3179 = vmatpush.bf16.msra.mxu2 %v3042_v0  ;;  %v3049_v3 = vld [vmem:[#allocation5 + $0x70] sm:$0xff]  ;;  %833 = vmatpush.bf16.msra.mxu0 %v3042_v0  ;;  %v3040_v4 = vld [vmem:[#allocation5 + $0x28] sm:$0xff] }
  0x1f   :  { %3187 = vmatpush.bf16.msra.mxu3 %v3050_v1  ;;  %882 = vmatpush.bf16.msra.mxu1 %v3050_v1  ;;  %v3048_v5 = vld [vmem:[#allocation5 + $0x68] sm:$0xff]  ;;  %v3039_v6 = vld [vmem:[#allocation5 + $0x20] sm:$0xff]  ;;  %v3038_v8 = vld [vmem:[#allocation5 + $0x18] sm:$0xff] }
  0x20   :  { %v3047_v7 = vld [vmem:[#allocation5 + $0x60] sm:$0xff]  ;;  %v3046_v9 = vld [vmem:[#allocation5 + $0x58] sm:$0xff]  ;;  %v3037_v10 = vld [vmem:[#allocation5 + $0x10] sm:$0xff] }
  0x21   :  { %v3045_v11 = vld [vmem:[#allocation5 + $0x50] sm:$0xff]  ;;  %v3036_v12 = vld [vmem:[#allocation5 + $0x8] sm:$0xff]  ;;  %v3035_v14 = vld [vmem:[#allocation5] sm:$0xff] }
  0x22   :  { %3180 = vmatpush.bf16.msra.mxu2 %v3041_v2  ;;  %834 = vmatpush.bf16.msra.mxu0 %v3041_v2  ;;  %v3044_v13 = vld [vmem:[#allocation5 + $0x48] sm:$0xff]  ;;  %v3043_v15 = vld [vmem:[#allocation5 + $0x40] sm:$0xff]  ;;  %v3058_v20 = vld [vmem:[#allocation5 + $0xb8] sm:$0xff] }
  0x23   :  { %3188 = vmatpush.bf16.msra.mxu3 %v3049_v3  ;;  %883 = vmatpush.bf16.msra.mxu1 %v3049_v3  ;;  %v189_v16 = vld [vmem:[#allocation2 + $0x200] sm:$0xff]  ;;  %v190_v18 = vld [vmem:[#allocation2 + $0x208] sm:$0xff]  ;;  %v3066_v21 = vld [vmem:[#allocation5 + $0xf8] sm:$0xff] }
  0x24   :  { %v197_v17 = vld [vmem:[#allocation2 + $0x240] sm:$0xff]  ;;  %v198_v19 = vld [vmem:[#allocation2 + $0x248] sm:$0xff]  ;;  %v3057_v28 = vld [vmem:[#allocation5 + $0xb0] sm:$0xff] }
  0x25   :  { %v125_v22 = vld [vmem:[#allocation2] sm:$0xff]  ;;  %v285_v24 = vpack.c.bf16 %v197_v17, %v189_v16  ;;  %v286_v25 = vpack.c.bf16 %v198_v19, %v190_v18  ;;  %v126_v26 = vld [vmem:[#allocation2 + $0x8] sm:$0xff]  ;;  %v3065_v30 = vld [vmem:[#allocation5 + $0xf0] sm:$0xff] }
  0x26   :  { %3181 = vmatpush.bf16.msra.mxu2 %v3040_v4  ;;  %835 = vmatpush.bf16.msra.mxu0 %v3040_v4  ;;  %v133_v23 = vld [vmem:[#allocation2 + $0x40] sm:$0xff]  ;;  %v134_v27 = vld [vmem:[#allocation2 + $0x48] sm:$0xff]  ;;  %v3074_v33 = vld [vmem:[#allocation5 + $0x138] sm:$0xff] }
  0x27   :  { %3189 = vmatpush.bf16.msra.mxu3 %v3048_v5  ;;  %884 = vmatpush.bf16.msra.mxu1 %v3048_v5  ;;  %v253_v29 = vpack.c.bf16 %v133_v23, %v125_v22  ;;  %v254_v31 = vpack.c.bf16 %v134_v27, %v126_v26  ;;  %v3056_v32 = vld [vmem:[#allocation5 + $0xa8] sm:$0xff]  ;;  %v3082_v35 = vld [vmem:[#allocation5 + $0x178] sm:$0xff]  ;;  %v3073_v36 = vld [vmem:[#allocation5 + $0x130] sm:$0xff] }
  0x28   :  { %v3064_v34 = vld [vmem:[#allocation5 + $0xe8] sm:$0xff]  ;;  %v3055_v37 = vld [vmem:[#allocation5 + $0xa0] sm:$0xff]  ;;  %v3054_v43 = vld [vmem:[#allocation5 + $0x98] sm:$0xff] }
  0x29   :  { %v3063_v38 = vld [vmem:[#allocation5 + $0xe0] sm:$0xff]  ;;  %v206_v41 = vld [vmem:[#allocation2 + $0x288] sm:$0xff]  ;;  %v3062_v46 = vld [vmem:[#allocation5 + $0xd8] sm:$0xff] }
  0x2a   :  { %3182 = vmatpush.bf16.msra.mxu2 %v3039_v6  ;;  %836 = vmatpush.bf16.msra.mxu0 %v3039_v6  ;;  %v205_v39 = vld [vmem:[#allocation2 + $0x280] sm:$0xff]  ;;  %v214_v42 = vld [vmem:[#allocation2 + $0x2c8] sm:$0xff]  ;;  %v3053_v52 = vld [vmem:[#allocation5 + $0x90] sm:$0xff] }
  0x2b   :  { %3190 = vmatpush.bf16.msra.mxu3 %v3047_v7  ;;  %885 = vmatpush.bf16.msra.mxu1 %v3047_v7  ;;  %v213_v40 = vld [vmem:[#allocation2 + $0x2c0] sm:$0xff]  ;;  %v294_v48 = vpack.c.bf16 %v214_v42, %v206_v41  ;;  %v142_v49 = vld [vmem:[#allocation2 + $0x88] sm:$0xff]  ;;  %v3061_v54 = vld [vmem:[#allocation5 + $0xd0] sm:$0xff] }
  0x2c   :  { %v141_v44 = vld [vmem:[#allocation2 + $0x80] sm:$0xff]  ;;  %v293_v47 = vpack.c.bf16 %v213_v40, %v205_v39  ;;  %v150_v50 = vld [vmem:[#allocation2 + $0xc8] sm:$0xff]  ;;  %v3081_v55 = vld [vmem:[#allocation5 + $0x170] sm:$0xff] }
  0x2d   :  { %v149_v45 = vld [vmem:[#allocation2 + $0xc0] sm:$0xff]  ;;  %v262_v53 = vpack.c.bf16 %v150_v50, %v142_v49  ;;  %v3072_v56 = vld [vmem:[#allocation5 + $0x128] sm:$0xff]  ;;  %v3070_v2 = vld [vmem:[#allocation5 + $0x118] sm:$0xff] }
  0x2e   :  { %3183 = vmatpush.bf16.msra.mxu2 %v3038_v8  ;;  %837 = vmatpush.bf16.msra.mxu0 %v3038_v8  ;;  %v261_v51 = vpack.c.bf16 %v149_v45, %v141_v44  ;;  %v3080_v57 = vld [vmem:[#allocation5 + $0x168] sm:$0xff]  ;;  %v3071_v60 = vld [vmem:[#allocation5 + $0x120] sm:$0xff]  ;;  %v3078_v5 = vld [vmem:[#allocation5 + $0x158] sm:$0xff] }
  0x2f   :  { %3191 = vmatpush.bf16.msra.mxu3 %v3046_v9  ;;  %886 = vmatpush.bf16.msra.mxu1 %v3046_v9  ;;  %v3052_v58 = vld [vmem:[#allocation5 + $0x88] sm:$0xff]  ;;  %v3079_v61 = vld [vmem:[#allocation5 + $0x160] sm:$0xff]  ;;  %v3090_v16 = vld [vmem:[#allocation5 + $0x1b8] sm:$0xff] }
  0x30   :  { %v3060_v59 = vld [vmem:[#allocation5 + $0xc8] sm:$0xff]  ;;  %v3051_v62 = vld [vmem:[#allocation5 + $0x80] sm:$0xff]  ;;  %v3098_v17 = vld [vmem:[#allocation5 + $0x1f8] sm:$0xff] }
  0x31   :  { %v3059_v63 = vld [vmem:[#allocation5 + $0xc0] sm:$0xff]  ;;  %v222_v3 = vld [vmem:[#allocation2 + $0x308] sm:$0xff]  ;;  %v136_v39 = vld [vmem:[#allocation2 + $0x58] sm:$0xff] }
  0x32   :  { %3184 = vmatpush.bf16.msra.mxu2 %v3037_v10  ;;  %838 = vmatpush.bf16.msra.mxu0 %v3037_v10  ;;  %v221_v0 = vld [vmem:[#allocation2 + $0x300] sm:$0xff]  ;;  %v230_v4 = vld [vmem:[#allocation2 + $0x348] sm:$0xff]  ;;  %v143_v50 = vld [vmem:[#allocation2 + $0x90] sm:$0xff] }
  0x33   :  { %3192 = vmatpush.bf16.msra.mxu3 %v3045_v11  ;;  %887 = vmatpush.bf16.msra.mxu1 %v3045_v11  ;;  %v229_v1 = vld [vmem:[#allocation2 + $0x340] sm:$0xff]  ;;  %v302_v9 = vpack.c.bf16 %v230_v4, %v222_v3  ;;  %v158_v10 = vld [vmem:[#allocation2 + $0x108] sm:$0xff]  ;;  %v168_v3 = vld [vmem:[#allocation2 + $0x158] sm:$0xff] }
  0x34   :  { %v157_v6 = vld [vmem:[#allocation2 + $0x100] sm:$0xff]  ;;  %v301_v8 = vpack.c.bf16 %v229_v1, %v221_v0  ;;  %v166_v11 = vld [vmem:[#allocation2 + $0x148] sm:$0xff]  ;;  %v159_v0 = vld [vmem:[#allocation2 + $0x110] sm:$0xff] }
  0x35   :  { %v165_v7 = vld [vmem:[#allocation2 + $0x140] sm:$0xff]  ;;  %v3068_v18 = vld [vmem:[#allocation5 + $0x108] sm:$0xff]  ;;  %v167_v1 = vld [vmem:[#allocation2 + $0x150] sm:$0xff] }
  0x36   :  { %3185 = vmatpush.bf16.msra.mxu2 %v3036_v12  ;;  %839 = vmatpush.bf16.msra.mxu0 %v3036_v12  ;;  %v3069_v12 = vld [vmem:[#allocation5 + $0x110] sm:$0xff]  ;;  %v3076_v19 = vld [vmem:[#allocation5 + $0x148] sm:$0xff]  ;;  %v237_v22 = vld [vmem:[#allocation2 + $0x380] sm:$0xff] }
  0x37   :  { %3193 = vmatpush.bf16.msra.mxu3 %v3044_v13  ;;  %888 = vmatpush.bf16.msra.mxu1 %v3044_v13  ;;  %v269_v13 = vpack.c.bf16 %v165_v7, %v157_v6  ;;  %v245_v23 = vld [vmem:[#allocation2 + $0x3c0] sm:$0xff]  ;;  %v130_v44 = vld [vmem:[#allocation2 + $0x28] sm:$0xff]  ;;  %v271_v6 = vpack.c.bf16 %v167_v1, %v159_v0 }
  0x38   :  { %v173_v26 = vld [vmem:[#allocation2 + $0x180] sm:$0xff]  ;;  %v138_v45 = vld [vmem:[#allocation2 + $0x68] sm:$0xff] }
  0x39   :  { %v181_v27 = vld [vmem:[#allocation2 + $0x1c0] sm:$0xff]  ;;  %v3096_v49 = vld [vmem:[#allocation5 + $0x1e8] sm:$0xff] }
  0x3a   :  { %3186 = vmatpush.bf16.msra.mxu2 %v3035_v14  ;;  %840 = vmatpush.bf16.msra.mxu0 %v3035_v14  ;;  %v270_v14 = vpack.c.bf16 %v166_v11, %v158_v10  ;;  %v129_v40 = vld [vmem:[#allocation2 + $0x20] sm:$0xff]  ;;  %v210_v0 = vld [vmem:[#allocation2 + $0x2a8] sm:$0xff] }
  0x3b   :  { %3194 = vmatpush.bf16.msra.mxu3 %v3043_v15  ;;  %889 = vmatpush.bf16.msra.mxu1 %v3043_v15  ;;  %v3077_v15 = vld [vmem:[#allocation5 + $0x150] sm:$0xff]  ;;  %v137_v41 = vld [vmem:[#allocation2 + $0x60] sm:$0xff]  ;;  %v218_v1 = vld [vmem:[#allocation2 + $0x2e8] sm:$0xff] }
  0x3c   :  { %v161_v4 = vld [vmem:[#allocation2 + $0x120] sm:$0xff] }
  0x3d   :  { %861 = vmatmul.bf16.vlgmr.msra.gmra.mxu2 %v285_v24  ;;  %841 = vmatmul.bf16.vlgmr.msra.gmra.mxu0 %v253_v29  ;;  %v238_v24 = vld [vmem:[#allocation2 + $0x388] sm:$0xff] }
  0x3e   :  { %931 = vmatpush.bf16.msrb.mxu2 %v3058_v20  ;;  %910 = vmatmul.bf16.vlgmr.msra.gmra.mxu3 %v286_v25  ;;  %v3067_v20 = vld [vmem:[#allocation5 + $0x100] sm:$0xff]  ;;  %v246_v25 = vld [vmem:[#allocation2 + $0x3c8] sm:$0xff] }
  0x3f   :  { %980 = vmatpush.bf16.msrb.mxu3 %v3066_v21  ;;  %890 = vmatmul.bf16.vlgmr.msra.gmra.mxu1 %v254_v31  ;;  %v3075_v21 = vld [vmem:[#allocation5 + $0x140] sm:$0xff]  ;;  %v310_v29 = vpack.c.bf16 %v246_v25, %v238_v24  ;;  %v182_v31 = vld [vmem:[#allocation2 + $0x1c8] sm:$0xff] }
  0x40   :  { %1029 = vmatpush.bf16.msrb.mxu0 %v3074_v33  ;;  %1078 = vmatpush.bf16.msrb.mxu1 %v3082_v35  ;;  %v3097_v35 = vld [vmem:[#allocation5 + $0x1f0] sm:$0xff] }
  0x42   :  { %932 = vmatpush.bf16.msrb.mxu2 %v3057_v28  ;;  %v309_v28 = vpack.c.bf16 %v245_v23, %v237_v22  ;;  %v178_v22 = vld [vmem:[#allocation2 + $0x1a8] sm:$0xff] }
  0x43   :  { %981 = vmatpush.bf16.msrb.mxu3 %v3065_v30  ;;  %v174_v30 = vld [vmem:[#allocation2 + $0x188] sm:$0xff] }
  0x44   :  { %1030 = vmatpush.bf16.msrb.mxu0 %v3073_v36  ;;  %1079 = vmatpush.bf16.msrb.mxu1 %v3081_v55  ;;  %v278_v33 = vpack.c.bf16 %v182_v31, %v174_v30  ;;  %v127_v36 = vld [vmem:[#allocation2 + $0x10] sm:$0xff]  ;;  %v153_v55 = vld [vmem:[#allocation2 + $0xe0] sm:$0xff]  ;;  %v186_v23 = vld [vmem:[#allocation2 + $0x1e8] sm:$0xff] }
  0x45   :  { %v282_v25 = vpack.c.bf16 %v186_v23, %v178_v22  ;;  %v192_v30 = vld [vmem:[#allocation2 + $0x218] sm:$0xff]  ;;  %v225_v23 = vld [vmem:[#allocation2 + $0x320] sm:$0xff] }
  0x46   :  { %933 = vmatpush.bf16.msrb.mxu2 %v3056_v32  ;;  %v277_v32 = vpack.c.bf16 %v181_v27, %v173_v26  ;;  %v3085_v26 = vld [vmem:[#allocation5 + $0x190] sm:$0xff]  ;;  %v200_v31 = vld [vmem:[#allocation2 + $0x258] sm:$0xff] }
  0x47   :  { %982 = vmatpush.bf16.msrb.mxu3 %v3064_v34  ;;  %v3089_v34 = vld [vmem:[#allocation5 + $0x1b0] sm:$0xff] }
  0x48   :  { %1031 = vmatpush.bf16.msrb.mxu0 %v3072_v56  ;;  %1080 = vmatpush.bf16.msrb.mxu1 %v3080_v57  ;;  %v3093_v27 = vld [vmem:[#allocation5 + $0x1d0] sm:$0xff] }
  0x4a   :  { %934 = vmatpush.bf16.msrb.mxu2 %v3055_v37  ;;  %v135_v37 = vld [vmem:[#allocation2 + $0x50] sm:$0xff] }
  0x4b   :  { %983 = vmatpush.bf16.msrb.mxu3 %v3063_v38  ;;  %v128_v38 = vld [vmem:[#allocation2 + $0x18] sm:$0xff]  ;;  %v255_v42 = vpack.c.bf16 %v135_v37, %v127_v36  ;;  %v194_v36 = vld [vmem:[#allocation2 + $0x228] sm:$0xff] }
  0x4c   :  { %1032 = vmatpush.bf16.msrb.mxu0 %v3071_v60  ;;  %1081 = vmatpush.bf16.msrb.mxu1 %v3079_v61  ;;  %v202_v37 = vld [vmem:[#allocation2 + $0x268] sm:$0xff] }
  0x4d   :  { %866 = vmatmul.bf16.gmra.mxu2 %v293_v47  ;;  %846 = vmatmul.bf16.gmra.mxu0 %v261_v51  ;;  %v258_v47 = vpack.c.bf16 %v138_v45, %v130_v44  ;;  %v151_v51 = vld [vmem:[#allocation2 + $0xd0] sm:$0xff]  ;;  %v3084_v44 = vld [vmem:[#allocation5 + $0x188] sm:$0xff] }
  0x4e   :  { %935 = vmatpush.bf16.msrb.mxu2 %v3054_v43  ;;  %915 = vmatmul.bf16.gmra.mxu3 %v294_v48  ;;  %v256_v43 = vpack.c.bf16 %v136_v39, %v128_v38  ;;  %v3088_v48 = vld [vmem:[#allocation5 + $0x1a8] sm:$0xff]  ;;  %v263_v56 = vpack.c.bf16 %v151_v51, %v143_v50  ;;  %v3480_v38 = vld [vmem:[%s3896_s2] ss:$0 sm:$0xff] }
  0x4f   :  { %984 = vmatpush.bf16.msrb.mxu3 %v3062_v46  ;;  %895 = vmatmul.bf16.gmra.mxu1 %v262_v53  ;;  %v257_v46 = vpack.c.bf16 %v137_v41, %v129_v40  ;;  %v152_v53 = vld [vmem:[#allocation2 + $0xd8] sm:$0xff]  ;;  %v290_v41 = vpack.c.bf16 %v202_v37, %v194_v36  ;;  %v3092_v45 = vld [vmem:[#allocation5 + $0x1c8] sm:$0xff] }
  0x50   :  { %1033 = vmatpush.bf16.msrb.mxu0 %v3070_v2  ;;  %1082 = vmatpush.bf16.msrb.mxu1 %v3078_v5  ;;  %v160_v2 = vld [vmem:[#allocation2 + $0x118] sm:$0xff]  ;;  %v169_v5 = vld [vmem:[#allocation2 + $0x160] sm:$0xff] }
  0x51   :  { %v272_v7 = vpack.c.bf16 %v168_v3, %v160_v2  ;;  %v273_v10 = vpack.c.bf16 %v169_v5, %v161_v4  ;;  %v298_v5 = vpack.c.bf16 %v218_v1, %v210_v0 }
  0x52   :  { %936 = vmatpush.bf16.msrb.mxu2 %v3053_v52  ;;  %v144_v52 = vld [vmem:[#allocation2 + $0x98] sm:$0xff] }
  0x53   :  { %985 = vmatpush.bf16.msrb.mxu3 %v3061_v54  ;;  %v145_v54 = vld [vmem:[#allocation2 + $0xa0] sm:$0xff]  ;;  %v264_v57 = vpack.c.bf16 %v152_v53, %v144_v52  ;;  %v207_v52 = vld [vmem:[#allocation2 + $0x290] sm:$0xff] }
  0x54   :  { %1034 = vmatpush.bf16.msrb.mxu0 %v3069_v12  ;;  %1083 = vmatpush.bf16.msrb.mxu1 %v3077_v15  ;;  %v265_v60 = vpack.c.bf16 %v153_v55, %v145_v54  ;;  %v3086_v12 = vld [vmem:[#allocation5 + $0x198] sm:$0xff]  ;;  %v183_v15 = vld [vmem:[#allocation2 + $0x1d0] sm:$0xff] }
  0x55   :  { %v215_v54 = vld [vmem:[#allocation2 + $0x2d0] sm:$0xff]  ;;  %v208_v55 = vld [vmem:[#allocation2 + $0x298] sm:$0xff] }
  0x56   :  { %937 = vmatpush.bf16.msrb.mxu2 %v3052_v58  ;;  %v146_v58 = vld [vmem:[#allocation2 + $0xa8] sm:$0xff] }
  0x57   :  { %986 = vmatpush.bf16.msrb.mxu3 %v3060_v59  ;;  %v154_v59 = vld [vmem:[#allocation2 + $0xe8] sm:$0xff] }
  0x58   :  { %1035 = vmatpush.bf16.msrb.mxu0 %v3068_v18  ;;  %1084 = vmatpush.bf16.msrb.mxu1 %v3076_v19  ;;  %v266_v61 = vpack.c.bf16 %v154_v59, %v146_v58  ;;  %v177_v18 = vld [vmem:[#allocation2 + $0x1a0] sm:$0xff] }
  0x59   :  { %v185_v19 = vld [vmem:[#allocation2 + $0x1e0] sm:$0xff] }
  0x5a   :  { %938 = vmatpush.bf16.msrb.mxu2 %v3051_v62  ;;  %v3087_v62 = vld [vmem:[#allocation5 + $0x1a0] sm:$0xff]  ;;  %v281_v24 = vpack.c.bf16 %v185_v19, %v177_v18  ;;  %v231_v18 = vld [vmem:[#allocation2 + $0x350] sm:$0xff]  ;;  %v224_v19 = vld [vmem:[#allocation2 + $0x318] sm:$0xff] }
  0x5b   :  { %987 = vmatpush.bf16.msrb.mxu3 %v3059_v63  ;;  %v3095_v63 = vld [vmem:[#allocation5 + $0x1e0] sm:$0xff] }
  0x5c   :  { %1036 = vmatpush.bf16.msrb.mxu0 %v3067_v20  ;;  %1085 = vmatpush.bf16.msrb.mxu1 %v3075_v21  ;;  %v209_v59 = vld [vmem:[#allocation2 + $0x2a0] sm:$0xff] }
  0x5d   :  { %871 = vmatmul.bf16.gmra.mxu2 %v301_v8  ;;  %851 = vmatmul.bf16.gmra.mxu0 %v269_v13  ;;  %v162_v8 = vld [vmem:[#allocation2 + $0x128] sm:$0xff]  ;;  %v3094_v13 = vld [vmem:[#allocation5 + $0x1d8] sm:$0xff] }
  0x5e   :  { %920 = vmatmul.bf16.gmra.mxu3 %v302_v9  ;;  %1127 = vmatpush.bf16.msra.mxu2 %v3090_v16  ;;  %v170_v9 = vld [vmem:[#allocation2 + $0x168] sm:$0xff]  ;;  %v176_v16 = vld [vmem:[#allocation2 + $0x198] sm:$0xff] }
  0x5f   :  { %900 = vmatmul.bf16.gmra.mxu1 %v270_v14  ;;  %1176 = vmatpush.bf16.msra.mxu3 %v3098_v17  ;;  %v274_v11 = vpack.c.bf16 %v170_v9, %v162_v8  ;;  %v175_v14 = vld [vmem:[#allocation2 + $0x190] sm:$0xff]  ;;  %v184_v17 = vld [vmem:[#allocation2 + $0x1d8] sm:$0xff]  ;;  %v3083_v8 = vld [vmem:[#allocation5 + $0x180] sm:$0xff] }
  0x60   :  { %v279_v20 = vpack.c.bf16 %v183_v15, %v175_v14  ;;  %v280_v21 = vpack.c.bf16 %v184_v17, %v176_v16  ;;  %v3091_v9 = vld [vmem:[#allocation5 + $0x1c0] sm:$0xff]  ;;  %v223_v16 = vld [vmem:[#allocation2 + $0x310] sm:$0xff] }
  0x62   :  { %1128 = vmatpush.bf16.msra.mxu2 %v3089_v34 }
  0x63   :  { %1177 = vmatpush.bf16.msra.mxu3 %v3097_v35  ;;  %v288_v35 = vpack.c.bf16 %v200_v31, %v192_v30 }
  0x66   :  { %1129 = vmatpush.bf16.msra.mxu2 %v3088_v48 }
  0x67   :  { %1178 = vmatpush.bf16.msra.mxu3 %v3096_v49 }
  0x6a   :  { %1130 = vmatpush.bf16.msra.mxu2 %v3087_v62  ;;  %v295_v62 = vpack.c.bf16 %v215_v54, %v207_v52  ;;  %v241_v54 = vld [vmem:[#allocation2 + $0x3a0] sm:$0xff] }
  0x6b   :  { %1179 = vmatpush.bf16.msra.mxu3 %v3095_v63 }
  0x6d   :  { %876 = vmatmul.bf16.gmra.mxu2 %v309_v28  ;;  %856 = vmatmul.bf16.gmra.mxu0 %v277_v32  ;;  %v191_v28 = vld [vmem:[#allocation2 + $0x210] sm:$0xff]  ;;  %v193_v32 = vld [vmem:[#allocation2 + $0x220] sm:$0xff] }
  0x6e   :  { %925 = vmatmul.bf16.gmra.mxu3 %v310_v29  ;;  %1131 = vmatpush.bf16.msra.mxu2 %v3086_v12  ;;  %v199_v29 = vld [vmem:[#allocation2 + $0x250] sm:$0xff] }
  0x6f   :  { %905 = vmatmul.bf16.gmra.mxu1 %v278_v33  ;;  %1180 = vmatpush.bf16.msra.mxu3 %v3094_v13  ;;  %v201_v33 = vld [vmem:[#allocation2 + $0x260] sm:$0xff]  ;;  %v287_v34 = vpack.c.bf16 %v199_v29, %v191_v28  ;;  %v226_v28 = vld [vmem:[#allocation2 + $0x328] sm:$0xff] }
  0x70   :  { %v289_v39 = vpack.c.bf16 %v201_v33, %v193_v32  ;;  %v234_v29 = vld [vmem:[#allocation2 + $0x368] sm:$0xff] }
  0x71   :  { %v306_v33 = vpack.c.bf16 %v234_v29, %v226_v28  ;;  %v3105_v29 = vld [vmem:[#allocation7 + $0x30] sm:$0xff] }
  0x72   :  { %1132 = vmatpush.bf16.msra.mxu2 %v3085_v26  ;;  %v303_v26 = vpack.c.bf16 %v231_v18, %v223_v16  ;;  %v140_v16 = vld [vmem:[#allocation2 + $0x78] sm:$0xff] }
  0x73   :  { %1181 = vmatpush.bf16.msra.mxu3 %v3093_v27 }
  0x76   :  { %1133 = vmatpush.bf16.msra.mxu2 %v3084_v44 }
  0x77   :  { %1182 = vmatpush.bf16.msra.mxu3 %v3092_v45  ;;  %v247_v45 = vld [vmem:[#allocation2 + $0x3d0] sm:$0xff] }
  0x7a   :  { %1134 = vmatpush.bf16.msra.mxu2 %v3083_v8 }
  0x7b   :  { %1183 = vmatpush.bf16.msra.mxu3 %v3091_v9  ;;  %v3106_v9 = vld [vmem:[#allocation7 + $0x38] sm:$0xff] }
  0x7c   :  { %1317 = vmatpush.bf16.msra.mxu0 %v3106_v9  ;;  %v179_v9 = vld [vmem:[#allocation2 + $0x1b0] sm:$0xff] }
  0x7d   :  { %939 = vmatmul.bf16.vlgmr.msrb.gmra.mxu2 %v255_v42  ;;  %1037 = vmatmul.bf16.vlgmr.msrb.gmra.mxu0 %v257_v46 }
  0x7e   :  { %988 = vmatmul.bf16.vlgmr.msrb.gmra.mxu3 %v256_v43 }
  0x7f   :  { %1086 = vmatmul.bf16.vlgmr.msrb.gmra.mxu1 %v258_v47 }
  0x80   :  { %1318 = vmatpush.bf16.msra.mxu0 %v3105_v29 }
  0x8d   :  { %944 = vmatmul.bf16.gmra.mxu2 %v263_v56  ;;  %1042 = vmatmul.bf16.gmra.mxu0 %v265_v60  ;;  %v216_v56 = vld [vmem:[#allocation2 + $0x2d8] sm:$0xff]  ;;  %v217_v60 = vld [vmem:[#allocation2 + $0x2e0] sm:$0xff] }
  0x8e   :  { %993 = vmatmul.bf16.gmra.mxu3 %v264_v57  ;;  %v296_v63 = vpack.c.bf16 %v216_v56, %v208_v55  ;;  %v297_v3 = vpack.c.bf16 %v217_v60, %v209_v59  ;;  %v249_v55 = vld [vmem:[#allocation2 + $0x3e0] sm:$0xff]  ;;  %v242_v59 = vld [vmem:[#allocation2 + $0x3a8] sm:$0xff] }
  0x8f   :  { %1091 = vmatmul.bf16.gmra.mxu1 %v266_v61  ;;  %v250_v60 = vld [vmem:[#allocation2 + $0x3e8] sm:$0xff] }
  0x90   :  { %v314_v0 = vpack.c.bf16 %v250_v60, %v242_v59 }
  0x9d   :  { %949 = vmatmul.bf16.gmra.mxu2 %v271_v6  ;;  %1047 = vmatmul.bf16.gmra.mxu0 %v273_v10 }
  0x9e   :  { %998 = vmatmul.bf16.gmra.mxu3 %v272_v7 }
  0x9f   :  { %1096 = vmatmul.bf16.gmra.mxu1 %v274_v11 }
  0xad   :  { %954 = vmatmul.bf16.gmra.mxu2 %v279_v20  ;;  %1052 = vmatmul.bf16.gmra.mxu0 %v281_v24  ;;  %v232_v20 = vld [vmem:[#allocation2 + $0x358] sm:$0xff]  ;;  %v233_v24 = vld [vmem:[#allocation2 + $0x360] sm:$0xff] }
  0xae   :  { %1003 = vmatmul.bf16.gmra.mxu3 %v280_v21  ;;  %v304_v27 = vpack.c.bf16 %v232_v20, %v224_v19  ;;  %v305_v31 = vpack.c.bf16 %v233_v24, %v225_v23 }
  0xaf   :  { %1101 = vmatmul.bf16.gmra.mxu1 %v282_v25 }
  0xba   :  { %v842_v40 = vpop.f32.mrf.mxu0 }
  0xbb   :  { %v843_v42 = vadd.f32 %v3480_v38, %v842_v40 }
  0xbc   :  { %v891_v43 = vpop.f32.mrf.mxu1 }
  0xbd   :  { %959 = vmatmul.bf16.gmra.mxu2 %v287_v34  ;;  %v3483_v46 = vadd.f32 %v891_v43, %v843_v42  ;;  %1057 = vmatmul.bf16.gmra.mxu0 %v289_v39  ;;  %v239_v43 = vld [vmem:[#allocation2 + $0x390] sm:$0xff] }
  0xbe   :  { %1008 = vmatmul.bf16.gmra.mxu3 %v288_v35 }
  0xbf   :  { %1106 = vmatmul.bf16.gmra.mxu1 %v290_v41 }
  0xc0   :  { %v862_v47 = vpop.f32.mrf.mxu2 }
  0xc1   :  { %v911_v48 = vpop.f32.mrf.mxu3  ;;  %v863_v49 = vadd.f32 %v3480_v38, %v862_v47  ;;  %v240_v47 = vld [vmem:[#allocation2 + $0x398] sm:$0xff] }
  0xc2   :  { %v3488_v51 = vpop.f32.mrf.mxu0 }
  0xc3   :  { %v3486_v50 = vadd.f32 %v911_v48, %v863_v49  ;;  %v248_v48 = vld [vmem:[#allocation2 + $0x3d8] sm:$0xff] }
  0xc4   :  { %v3490_v53 = vpop.f32.mrf.mxu1 }
  0xc8   :  { %v864_v57 = vpop.f32.mrf.mxu2 }
  0xc9   :  { %v913_v58 = vpop.f32.mrf.mxu3  ;;  %v865_v61 = vadd.f32 %v3480_v38, %v864_v57  ;;  %v311_v57 = vpack.c.bf16 %v247_v45, %v239_v43 }
  0xca   :  { %v847_v4 = vpop.f32.mrf.mxu0 }
  0xcb   :  { %v3493_v2 = vadd.f32 %v913_v58, %v865_v61  ;;  %v848_v6 = vadd.f32 %v3480_v38, %v847_v4  ;;  %v312_v58 = vpack.c.bf16 %v248_v48, %v240_v47 }
  0xcc   :  { %v896_v7 = vpop.f32.mrf.mxu1 }
  0xcd   :  { %964 = vmatmul.bf16.gmra.mxu2 %v295_v62  ;;  %v3496_v10 = vadd.f32 %v896_v7, %v848_v6  ;;  %1062 = vmatmul.bf16.gmra.mxu0 %v297_v3  ;;  %v313_v62 = vpack.c.bf16 %v249_v55, %v241_v54  ;;  %v163_v55 = vld [vmem:[#allocation2 + $0x130] sm:$0xff] }
  0xce   :  { %1013 = vmatmul.bf16.gmra.mxu3 %v296_v63 }
  0xcf   :  { %1111 = vmatmul.bf16.gmra.mxu1 %v298_v5 }
  0xd0   :  { %v867_v11 = vpop.f32.mrf.mxu2 }
  0xd1   :  { %v916_v12 = vpop.f32.mrf.mxu3  ;;  %v868_v13 = vadd.f32 %v3480_v38, %v867_v11  ;;  %v131_v11 = vld [vmem:[#allocation2 + $0x30] sm:$0xff] }
  0xd2   :  { %v3501_v15 = vpop.f32.mrf.mxu0 }
  0xd3   :  { %v3499_v14 = vadd.f32 %v916_v12, %v868_v13  ;;  %v139_v12 = vld [vmem:[#allocation2 + $0x70] sm:$0xff]  ;;  %v132_v13 = vld [vmem:[#allocation2 + $0x38] sm:$0xff]  ;;  %v850_v48 = vadd.f32 %v3480_v38, %v3501_v15 }
  0xd4   :  { %v3503_v17 = vpop.f32.mrf.mxu1 }
  0xd5   :  { %v899_v54 = vadd.f32 %v3503_v17, %v850_v48 }
  0xd8   :  { %v869_v21 = vpop.f32.mrf.mxu2 }
  0xd9   :  { %v918_v22 = vpop.f32.mrf.mxu3  ;;  %v870_v25 = vadd.f32 %v3480_v38, %v869_v21  ;;  %v259_v21 = vpack.c.bf16 %v139_v12, %v131_v11  ;;  %v187_v11 = vld [vmem:[#allocation2 + $0x1f0] sm:$0xff]  ;;  %v180_v12 = vld [vmem:[#allocation2 + $0x1b8] sm:$0xff] }
  0xda   :  { %v852_v32 = vpop.f32.mrf.mxu0 }
  0xdb   :  { %v3506_v30 = vadd.f32 %v918_v22, %v870_v25  ;;  %v853_v34 = vadd.f32 %v3480_v38, %v852_v32  ;;  %v260_v22 = vpack.c.bf16 %v140_v16, %v132_v13  ;;  %v147_v32 = vld [vmem:[#allocation2 + $0xb0] sm:$0xff]  ;;  %v188_v13 = vld [vmem:[#allocation2 + $0x1f8] sm:$0xff] }
  0xdc   :  { %v901_v35 = vpop.f32.mrf.mxu1 }
  0xdd   :  { %969 = vmatmul.bf16.gmra.mxu2 %v303_v26  ;;  %v3509_v36 = vadd.f32 %v901_v35, %v853_v34  ;;  %1067 = vmatmul.bf16.gmra.mxu0 %v305_v31  ;;  %v845_v26 = vadd.f32 %v3480_v38, %v3488_v51  ;;  %v148_v34 = vld [vmem:[#allocation2 + $0xb8] sm:$0xff] }
  0xde   :  { %1018 = vmatmul.bf16.gmra.mxu3 %v304_v27  ;;  %v156_v35 = vld [vmem:[#allocation2 + $0xf8] sm:$0xff] }
  0xdf   :  { %1116 = vmatmul.bf16.gmra.mxu1 %v306_v33  ;;  %v894_v31 = vadd.f32 %v3490_v53, %v845_v26  ;;  %v155_v33 = vld [vmem:[#allocation2 + $0xf0] sm:$0xff]  ;;  %v268_v45 = vpack.c.bf16 %v156_v35, %v148_v34  ;;  %v196_v34 = vld [vmem:[#allocation2 + $0x238] sm:$0xff] }
  0xe0   :  { %v872_v37 = vpop.f32.mrf.mxu2  ;;  %v267_v43 = vpack.c.bf16 %v155_v33, %v147_v32  ;;  %v195_v32 = vld [vmem:[#allocation2 + $0x230] sm:$0xff]  ;;  %v204_v35 = vld [vmem:[#allocation2 + $0x278] sm:$0xff] }
  0xe1   :  { %v921_v39 = vpop.f32.mrf.mxu3  ;;  %v873_v40 = vadd.f32 %v3480_v38, %v872_v37  ;;  %v203_v33 = vld [vmem:[#allocation2 + $0x270] sm:$0xff] }
  0xe2   :  { %v3514_v42 = vpop.f32.mrf.mxu0 }
  0xe3   :  { %v3512_v41 = vadd.f32 %v921_v39, %v873_v40 }
  0xe4   :  { %v3516_v44 = vpop.f32.mrf.mxu1 }
  0xe8   :  { %v874_v49 = vpop.f32.mrf.mxu2 }
  0xe9   :  { %v923_v52 = vpop.f32.mrf.mxu3  ;;  %v875_v56 = vadd.f32 %v3480_v38, %v874_v49 }
  0xea   :  { %v857_v63 = vpop.f32.mrf.mxu0 }
  0xeb   :  { %v3519_v61 = vadd.f32 %v923_v52, %v875_v56  ;;  %v858_v1 = vadd.f32 %v3480_v38, %v857_v63  ;;  %v3104_v52 = vld [vmem:[#allocation7 + $0x28] sm:$0xff]  ;;  %v171_v56 = vld [vmem:[#allocation2 + $0x170] sm:$0xff] }
  0xec   :  { %v906_v3 = vpop.f32.mrf.mxu1  ;;  %1319 = vmatpush.bf16.msra.mxu0 %v3104_v52  ;;  %v275_v63 = vpack.c.bf16 %v171_v56, %v163_v55  ;;  %v211_v52 = vld [vmem:[#allocation2 + $0x2b0] sm:$0xff]  ;;  %v212_v55 = vld [vmem:[#allocation2 + $0x2b8] sm:$0xff] }
  0xed   :  { %974 = vmatmul.bf16.gmra.mxu2 %v311_v57  ;;  %v3522_v4 = vadd.f32 %v906_v3, %v858_v1  ;;  %1072 = vmatmul.bf16.gmra.mxu0 %v313_v62  ;;  %v164_v57 = vld [vmem:[#allocation2 + $0x138] sm:$0xff]  ;;  %v855_v3 = vadd.f32 %v3480_v38, %v3514_v42 }
  0xee   :  { %1023 = vmatmul.bf16.gmra.mxu3 %v312_v58  ;;  %v172_v58 = vld [vmem:[#allocation2 + $0x178] sm:$0xff] }
  0xef   :  { %1121 = vmatmul.bf16.gmra.mxu1 %v314_v0  ;;  %v276_v0 = vpack.c.bf16 %v172_v58, %v164_v57  ;;  %v220_v56 = vld [vmem:[#allocation2 + $0x2f8] sm:$0xff] }
  0xf0   :  { %v877_v5 = vpop.f32.mrf.mxu2 }
  0xf1   :  { %v926_v6 = vpop.f32.mrf.mxu3  ;;  %v878_v7 = vadd.f32 %v3480_v38, %v877_v5 }
  0xf3   :  { %v3525_v8 = vadd.f32 %v926_v6, %v878_v7  ;;  %v3103_v6 = vld [vmem:[#allocation7 + $0x20] sm:$0xff]  ;;  %v904_v7 = vadd.f32 %v3516_v44, %v855_v3  ;;  %v235_v3 = vld [vmem:[#allocation2 + $0x370] sm:$0xff] }
  0xf4   :  { %1320 = vmatpush.bf16.msra.mxu0 %v3103_v6  ;;  %v908_v29 = vpop.f32.mrf.mxu1  ;;  %v236_v6 = vld [vmem:[#allocation2 + $0x378] sm:$0xff] }
  0xf8   :  { %v879_v18 = vpop.f32.mrf.mxu2 }
  0xf9   :  { %v928_v19 = vpop.f32.mrf.mxu3  ;;  %v880_v20 = vadd.f32 %v3480_v38, %v879_v18 }
  0xfb   :  { %v3528_v23 = vadd.f32 %v928_v19, %v880_v20  ;;  %v283_v20 = vpack.c.bf16 %v187_v11, %v179_v9 }
  0xfd   :  { %1135 = vmatmul.bf16.vlgmr.msra.gmra.mxu2 %v259_v21  ;;  %v284_v21 = vpack.c.bf16 %v188_v13, %v180_v12 }
  0xfe   :  { %1184 = vmatmul.bf16.vlgmr.msra.gmra.mxu3 %v260_v22 }
 0x100   :  { %v940_v24 = vpop.f32.mrf.mxu2 }
 0x101   :  { %v989_v25 = vpop.f32.mrf.mxu3  ;;  %v941_v27 = vadd.f32 %v940_v24, %v3483_v46 }
 0x103   :  { %v3533_v28 = vadd.f32 %v989_v25, %v941_v27  ;;  %v3102_v27 = vld [vmem:[#allocation7 + $0x18] sm:$0xff] }
 0x104   :  { %1321 = vmatpush.bf16.msra.mxu0 %v3102_v27 }
 0x108   :  { %v942_v37 = vpop.f32.mrf.mxu2 }
 0x109   :  { %v991_v39 = vpop.f32.mrf.mxu3  ;;  %v943_v40 = vadd.f32 %v942_v37, %v894_v31 }
 0x10b   :  { %v3536_v47 = vadd.f32 %v991_v39, %v943_v40 }
 0x10d   :  { %1140 = vmatmul.bf16.gmra.mxu2 %v267_v43  ;;  %v291_v43 = vpack.c.bf16 %v203_v33, %v195_v32 }
 0x10e   :  { %1189 = vmatmul.bf16.gmra.mxu3 %v268_v45  ;;  %v292_v45 = vpack.c.bf16 %v204_v35, %v196_v34 }
 0x110   :  { %v945_v46 = vpop.f32.mrf.mxu2 }
 0x111   :  { %v994_v51 = vpop.f32.mrf.mxu3  ;;  %v946_v53 = vadd.f32 %v945_v46, %v3496_v10 }
 0x113   :  { %v3541_v49 = vadd.f32 %v994_v51, %v946_v53  ;;  %v3101_v53 = vld [vmem:[#allocation7 + $0x10] sm:$0xff] }
 0x114   :  { %1322 = vmatpush.bf16.msra.mxu0 %v3101_v53 }
 0x118   :  { %v947_v59 = vpop.f32.mrf.mxu2 }
 0x119   :  { %v996_v60 = vpop.f32.mrf.mxu3  ;;  %v948_v62 = vadd.f32 %v947_v59, %v899_v54  ;;  %v219_v54 = vld [vmem:[#allocation2 + $0x2f0] sm:$0xff] }
 0x11a   :  { %v299_v59 = vpack.c.bf16 %v219_v54, %v211_v52 }
 0x11b   :  { %v3544_v1 = vadd.f32 %v996_v60, %v948_v62  ;;  %v300_v60 = vpack.c.bf16 %v220_v56, %v212_v55 }
 0x11d   :  { %1145 = vmatmul.bf16.gmra.mxu2 %v275_v63 }
 0x11e   :  { %1194 = vmatmul.bf16.gmra.mxu3 %v276_v0 }
 0x120   :  { %v950_v10 = vpop.f32.mrf.mxu2 }
 0x121   :  { %v999_v15 = vpop.f32.mrf.mxu3  ;;  %v951_v17 = vadd.f32 %v950_v10, %v3509_v36  ;;  %v859_v36 = vpop.f32.mrf.mxu0  ;;  %v3100_v10 = vld [vmem:[#allocation7 + $0x8] sm:$0xff] }
 0x122   :  { %v860_v25 = vadd.f32 %v3480_v38, %v859_v36  ;;  %1323 = vmatpush.bf16.msra.mxu0 %v3100_v10  ;;  %v243_v36 = vld [vmem:[#allocation2 + $0x3b0] sm:$0xff] }
 0x123   :  { %v3549_v5 = vadd.f32 %v999_v15, %v951_v17  ;;  %v227_v15 = vld [vmem:[#allocation2 + $0x330] sm:$0xff]  ;;  %v228_v17 = vld [vmem:[#allocation2 + $0x338] sm:$0xff] }
 0x124   :  { %v909_v31 = vadd.f32 %v908_v29, %v860_v25  ;;  %v307_v12 = vpack.c.bf16 %v235_v3, %v227_v15  ;;  %v308_v13 = vpack.c.bf16 %v236_v6, %v228_v17  ;;  %v244_v25 = vld [vmem:[#allocation2 + $0x3b8] sm:$0xff] }
 0x128   :  { %v952_v16 = vpop.f32.mrf.mxu2 }
 0x129   :  { %v1001_v18 = vpop.f32.mrf.mxu3  ;;  %v953_v19 = vadd.f32 %v952_v16, %v904_v7  ;;  %v1038_v11 = vpop.f32.mrf.mxu0 }
 0x12a   :  { %v1087_v16 = vpop.f32.mrf.mxu1  ;;  %v1039_v53 = vadd.f32 %v1038_v11, %v3533_v28 }
 0x12b   :  { %v3552_v22 = vadd.f32 %v1001_v18, %v953_v19 }
 0x12c   :  { %v1088_v56 = vadd.f32 %v1087_v16, %v1039_v53 }
 0x12d   :  { %1150 = vmatmul.bf16.gmra.mxu2 %v283_v20 }
 0x12e   :  { %1199 = vmatmul.bf16.gmra.mxu3 %v284_v21 }
 0x130   :  { %v955_v42 = vpop.f32.mrf.mxu2 }
 0x131   :  { %v1004_v24 = vpop.f32.mrf.mxu3  ;;  %v956_v44 = vadd.f32 %v955_v42, %v3522_v4  ;;  %v1040_v20 = vpop.f32.mrf.mxu0  ;;  %v3099_v42 = vld [vmem:[#allocation7] sm:$0xff] }
 0x132   :  { %v1089_v27 = vpop.f32.mrf.mxu1  ;;  %1324 = vmatpush.bf16.msra.mxu0 %v3099_v42 }
 0x133   :  { %v3556_v26 = vadd.f32 %v1004_v24, %v956_v44  ;;  %v251_v24 = vld [vmem:[#allocation2 + $0x3f0] sm:$0xff]  ;;  %v252_v44 = vld [vmem:[#allocation2 + $0x3f8] sm:$0xff] }
 0x134   :  { %v315_v32 = vpack.c.bf16 %v251_v24, %v243_v36  ;;  %v316_v33 = vpack.c.bf16 %v252_v44, %v244_v25 }
 0x138   :  { %v957_v37 = vpop.f32.mrf.mxu2 }
 0x139   :  { %v1006_v39 = vpop.f32.mrf.mxu3  ;;  %v958_v40 = vadd.f32 %v957_v37, %v909_v31  ;;  %v1043_v34 = vpop.f32.mrf.mxu0 }
 0x13a   :  { %v1092_v37 = vpop.f32.mrf.mxu1  ;;  %v1044_v28 = vadd.f32 %v1043_v34, %v3541_v49  ;;  %v3112_v34 = vld [vmem:[#allocation8 + $0x28] sm:$0xff] }
 0x13b   :  { %v3558_v46 = vadd.f32 %v1006_v39, %v958_v40 }
 0x13d   :  { %1155 = vmatmul.bf16.gmra.mxu2 %v291_v43 }
 0x13e   :  { %1204 = vmatmul.bf16.gmra.mxu3 %v292_v45 }
 0x140   :  { %v960_v38 = vpop.f32.mrf.mxu2 }
 0x141   :  { %v1009_v4 = vpop.f32.mrf.mxu3  ;;  %v961_v51 = vadd.f32 %v960_v38, %v3486_v50  ;;  %v1045_v43 = vpop.f32.mrf.mxu0 }
 0x143   :  { %v3561_v48 = vadd.f32 %v1009_v4, %v961_v51  ;;  %v1094_v4 = vpop.f32.mrf.mxu1  ;;  %v3114_v51 = vld [vmem:[#allocation8 + $0x38] sm:$0xff] }
 0x144   :  { %1442 = vmatpush.bf16.msra.mxu1 %v3114_v51 }
 0x148   :  { %v3563_v57 = vpop.f32.mrf.mxu2 }
 0x149   :  { %v3565_v58 = vpop.f32.mrf.mxu3  ;;  %v1048_v55 = vpop.f32.mrf.mxu0 }
 0x14d   :  { %1160 = vmatmul.bf16.gmra.mxu2 %v299_v59  ;;  %v1041_v59 = vadd.f32 %v1040_v20, %v3536_v47  ;;  %v1093_v47 = vadd.f32 %v1092_v37, %v1044_v28 }
 0x14e   :  { %1209 = vmatmul.bf16.gmra.mxu3 %v300_v60  ;;  %v1097_v60 = vpop.f32.mrf.mxu1 }
 0x150   :  { %v965_v62 = vpop.f32.mrf.mxu2 }
 0x151   :  { %v1014_v63 = vpop.f32.mrf.mxu3  ;;  %v966_v50 = vadd.f32 %v965_v62, %v3499_v14  ;;  %v1090_v62 = vadd.f32 %v1089_v27, %v1041_v59  ;;  %v1050_v3 = vpop.f32.mrf.mxu0 }
 0x153   :  { %v3568_v0 = vadd.f32 %v1014_v63, %v966_v50 }
 0x156   :  { %v1099_v11 = vpop.f32.mrf.mxu1 }
 0x158   :  { %v3570_v7 = vpop.f32.mrf.mxu2 }
 0x159   :  { %v3572_v9 = vpop.f32.mrf.mxu3  ;;  %v1053_v20 = vpop.f32.mrf.mxu0 }
 0x15d   :  { %1165 = vmatmul.bf16.gmra.mxu2 %v307_v12 }
 0x15e   :  { %1214 = vmatmul.bf16.gmra.mxu3 %v308_v13  ;;  %v3113_v13 = vld [vmem:[#allocation8 + $0x30] sm:$0xff]  ;;  %v1102_v44 = vpop.f32.mrf.mxu1 }
 0x15f   :  { %1443 = vmatpush.bf16.msra.mxu1 %v3113_v13 }
 0x160   :  { %v970_v18 = vpop.f32.mrf.mxu2 }
 0x161   :  { %v1019_v14 = vpop.f32.mrf.mxu3  ;;  %v971_v19 = vadd.f32 %v970_v18, %v3512_v41 }
 0x163   :  { %v3575_v21 = vadd.f32 %v1019_v14, %v971_v19  ;;  %v1046_v19 = vadd.f32 %v1045_v43, %v3544_v1  ;;  %1444 = vmatpush.bf16.msra.mxu1 %v3112_v34  ;;  %v1051_v43 = vadd.f32 %v1050_v3, %v3552_v22 }
 0x165   :  { %v1095_v42 = vadd.f32 %v1094_v4, %v1046_v19 }
 0x166   :  { %v1104_v4 = vpop.f32.mrf.mxu1 }
 0x168   :  { %v3577_v29 = vpop.f32.mrf.mxu2 }
 0x169   :  { %v3579_v31 = vpop.f32.mrf.mxu3 }
 0x16d   :  { %1170 = vmatmul.bf16.gmra.mxu2 %v315_v32 }
 0x16e   :  { %1219 = vmatmul.bf16.gmra.mxu3 %v316_v33 }
 0x170   :  { %v975_v41 = vpop.f32.mrf.mxu2 }
 0x171   :  { %v1024_v35 = vpop.f32.mrf.mxu3  ;;  %v976_v39 = vadd.f32 %v975_v41, %v3525_v8 }
 0x173   :  { %v3582_v40 = vadd.f32 %v1024_v35, %v976_v39  ;;  %v1049_v35 = vadd.f32 %v1048_v55, %v3549_v5  ;;  %v1055_v39 = vpop.f32.mrf.mxu0 }
 0x174   :  { %v1056_v3 = vadd.f32 %v1055_v39, %v3558_v46 }
 0x175   :  { %v1098_v1 = vadd.f32 %v1097_v60, %v1049_v35 }
 0x178   :  { %v3584_v45 = vpop.f32.mrf.mxu2 }
 0x179   :  { %v3586_v38 = vpop.f32.mrf.mxu3 }
 0x180   :  { %v1136_v52 = vpop.f32.mrf.mxu2 }
 0x181   :  { %v1185_v54 = vpop.f32.mrf.mxu3  ;;  %v1137_v8 = vadd.f32 %v1136_v52, %v1088_v56 }
 0x183   :  { %v1186_v10 = vadd.f32 %v1185_v54, %v1137_v8  ;;  %v1100_v54 = vadd.f32 %v1099_v11, %v1051_v43  ;;  %v1058_v8 = vpop.f32.mrf.mxu0  ;;  %v1105_v11 = vadd.f32 %v1104_v4, %v1056_v3  ;;  %v3108_v3 = vld [vmem:[#allocation8 + $0x8] sm:$0xff] }
 0x185   :  { %v1225_v6 = vmax.f32 %v1186_v10, 0.0  ;;  %v1107_v10 = vpop.f32.mrf.mxu1 }
 0x188   :  { %v1138_v63 = vpop.f32.mrf.mxu2 }
 0x189   :  { %v1187_v50 = vpop.f32.mrf.mxu3  ;;  %v1139_v15 = vadd.f32 %v1138_v63, %v1090_v62 }
 0x18b   :  { %v1188_v17 = vadd.f32 %v1187_v50, %v1139_v15  ;;  %v3111_v15 = vld [vmem:[#allocation8 + $0x20] sm:$0xff]  ;;  %v1060_v13 = vpop.f32.mrf.mxu0 }
 0x18c   :  { %1445 = vmatpush.bf16.msra.mxu1 %v3111_v15 }
 0x18d   :  { %v1226_v12 = vmax.f32 %v1188_v17, 0.0  ;;  %v1054_v17 = vadd.f32 %v1053_v20, %v3556_v26 }
 0x18f   :  { %v1241_v18 = vpack.c.bf16 %v1226_v12, %v1225_v6  ;;  %v1103_v22 = vadd.f32 %v1102_v44, %v1054_v17  ;;  %v1059_v44 = vadd.f32 %v1058_v8, %v3561_v48  ;;  %v968_v48 = vadd.f32 %v3570_v7, %v3506_v30 }
 0x190   :  { %v1141_v16 = vpop.f32.mrf.mxu2 }
 0x191   :  { %v1190_v14 = vpop.f32.mrf.mxu3  ;;  %1325 = vmatmul.bf16.vlgmr.msra.gmra.mxu0 %v1241_v18  ;;  %v1142_v36 = vadd.f32 %v1141_v16, %v1093_v47  ;;  %v1109_v18 = vpop.f32.mrf.mxu1 }
 0x193   :  { %v1191_v27 = vadd.f32 %v1190_v14, %v1142_v36  ;;  %v963_v36 = vadd.f32 %v3563_v57, %v3493_v2  ;;  %v1063_v20 = vpop.f32.mrf.mxu0 }
 0x195   :  { %v1227_v41 = vmax.f32 %v1191_v27, 0.0  ;;  %v1012_v46 = vadd.f32 %v3565_v58, %v963_v36 }
 0x197   :  { %v1061_v34 = vadd.f32 %v1060_v13, %v1012_v46 }
 0x198   :  { %v1143_v24 = vpop.f32.mrf.mxu2 }
 0x199   :  { %v1192_v25 = vpop.f32.mrf.mxu3  ;;  %v1144_v32 = vadd.f32 %v1143_v24, %v1095_v42  ;;  %v1110_v39 = vadd.f32 %v1109_v18, %v1061_v34 }
 0x19b   :  { %v1193_v33 = vadd.f32 %v1192_v25, %v1144_v32  ;;  %v3110_v25 = vld [vmem:[#allocation8 + $0x18] sm:$0xff]  ;;  %v1065_v2 = vpop.f32.mrf.mxu0 }
 0x19c   :  { %1446 = vmatpush.bf16.msra.mxu1 %v3110_v25 }
 0x19d   :  { %v1228_v49 = vmax.f32 %v1193_v33, 0.0 }
 0x19f   :  { %v1242_v51 = vpack.c.bf16 %v1228_v49, %v1227_v41  ;;  %v1112_v41 = vpop.f32.mrf.mxu1  ;;  %v1108_v49 = vadd.f32 %v1107_v10, %v1059_v44 }
 0x1a0   :  { %v1146_v37 = vpop.f32.mrf.mxu2 }
 0x1a1   :  { %v1195_v53 = vpop.f32.mrf.mxu3  ;;  %1330 = vmatmul.bf16.gmra.mxu0 %v1242_v51  ;;  %v1147_v52 = vadd.f32 %v1146_v37, %v1098_v1 }
 0x1a3   :  { %v1196_v62 = vadd.f32 %v1195_v53, %v1147_v52  ;;  %v3109_v52 = vld [vmem:[#allocation8 + $0x10] sm:$0xff] }
 0x1a4   :  { %1447 = vmatpush.bf16.msra.mxu1 %v3109_v52  ;;  %v3171_v52 = vld [vmem:[#allocation10 + $0x1c4] sm:$0xf] }
 0x1a5   :  { %v1229_v5 = vmax.f32 %v1196_v62, 0.0 }
 0x1a7   :  { %v1114_v1 = vpop.f32.mrf.mxu1 }
 0x1a8   :  { %v1148_v56 = vpop.f32.mrf.mxu2  ;;  %1448 = vmatpush.bf16.msra.mxu1 %v3108_v3 }
 0x1a9   :  { %v1197_v59 = vpop.f32.mrf.mxu3  ;;  %v1149_v63 = vadd.f32 %v1148_v56, %v1100_v54  ;;  %v1064_v54 = vadd.f32 %v1063_v20, %v3568_v0  ;;  %v1017_v56 = vadd.f32 %v3572_v9, %v968_v48  ;;  %v973_v0 = vadd.f32 %v3577_v29, %v3519_v61 }
 0x1ab   :  { %v1198_v50 = vadd.f32 %v1197_v59, %v1149_v63  ;;  %v1068_v63 = vpop.f32.mrf.mxu0  ;;  %v1066_v10 = vadd.f32 %v1065_v2, %v1017_v56  ;;  %v3007_v56 = vld [vmem:[#allocation10 + $0x1e0] sm:$0xf0] }
 0x1ac   :  { %v1069_v13 = vadd.f32 %v1068_v63, %v3575_v21  ;;  %v3172_v63 = vld [vmem:[#allocation10 + $0x1cc] sm:$0xf] }
 0x1ad   :  { %v1230_v55 = vmax.f32 %v1198_v50, 0.0  ;;  %v1113_v50 = vadd.f32 %v1112_v41, %v1064_v54  ;;  %v1115_v30 = vadd.f32 %v1114_v1, %v1066_v10  ;;  %v3015_v10 = vld [vmem:[#allocation10 + $0x1e8] sm:$0xf0] }
 0x1af   :  { %v1243_v6 = vpack.c.bf16 %v1230_v55, %v1229_v5  ;;  %v1117_v5 = vpop.f32.mrf.mxu1 }
 0x1b0   :  { %v1151_v60 = vpop.f32.mrf.mxu2 }
 0x1b1   :  { %v1200_v12 = vpop.f32.mrf.mxu3  ;;  %1335 = vmatmul.bf16.gmra.mxu0 %v1243_v6  ;;  %v1152_v28 = vadd.f32 %v1151_v60, %v1103_v22 }
 0x1b3   :  { %v1201_v47 = vadd.f32 %v1200_v12, %v1152_v28  ;;  %v1070_v60 = vpop.f32.mrf.mxu0  ;;  %v1022_v28 = vadd.f32 %v3579_v31, %v973_v0  ;;  %v978_v31 = vadd.f32 %v3584_v45, %v3528_v23  ;;  %v2973_v0 = vld [vmem:[#allocation10 + $0x180] sm:$0xf] }
 0x1b5   :  { %v1231_v42 = vmax.f32 %v1201_v47, 0.0  ;;  %v3107_v47 = vld [vmem:[#allocation8] sm:$0xff]  ;;  %v1071_v36 = vadd.f32 %v1070_v60, %v1022_v28  ;;  %v3168_v28 = vld [vmem:[#allocation10 + $0x1a4] sm:$0xf0] }
 0x1b6   :  { %1449 = vmatpush.bf16.msra.mxu1 %v3107_v47  ;;  %v3167_v60 = vld [vmem:[#allocation10 + $0x19c] sm:$0xf0] }
 0x1b8   :  { %v1153_v16 = vpop.f32.mrf.mxu2 }
 0x1b9   :  { %v1202_v14 = vpop.f32.mrf.mxu3  ;;  %v1154_v19 = vadd.f32 %v1153_v16, %v1105_v11  ;;  %v1119_v11 = vpop.f32.mrf.mxu1 }
 0x1bb   :  { %v1203_v26 = vadd.f32 %v1202_v14, %v1154_v19  ;;  %v1118_v19 = vadd.f32 %v1117_v5, %v1069_v13  ;;  %v1073_v61 = vpop.f32.mrf.mxu0  ;;  %v3018_v5 = vor.u32 %v3172_v63, %v3015_v10  ;;  %v2981_v13 = vld [vmem:[#allocation10 + $0x188] sm:$0xf] }
 0x1bd   :  { %v1232_v24 = vmax.f32 %v1203_v26, 0.0  ;;  %v1120_v26 = vadd.f32 %v1119_v11, %v1071_v36  ;;  %2064 = vmatpush.bf16.msrb.mxu1 %v3018_v5  ;;  %v3164_v11 = vld [vmem:[#allocation10 + $0x18c] sm:$0xf]  ;;  %v2885_v5 = vld [vmem:[#allocation10 + $0xc8] sm:$0xf] }
 0x1bf   :  { %v1244_v27 = vpack.c.bf16 %v1232_v24, %v1231_v42 }
 0x1c0   :  { %v1156_v32 = vpop.f32.mrf.mxu2 }
 0x1c1   :  { %v1205_v33 = vpop.f32.mrf.mxu3  ;;  %1340 = vmatmul.bf16.gmra.mxu0 %v1244_v27  ;;  %v1157_v35 = vadd.f32 %v1156_v32, %v1108_v49  ;;  %v1122_v21 = vpop.f32.mrf.mxu1  ;;  %v1074_v32 = vadd.f32 %v1073_v61, %v3582_v40 }
 0x1c3   :  { %v1206_v37 = vadd.f32 %v1205_v33, %v1157_v35  ;;  %v1027_v33 = vadd.f32 %v3586_v38, %v978_v31  ;;  %v1075_v41 = vpop.f32.mrf.mxu0  ;;  %v3005_v38 = vld [vmem:[#allocation10 + $0x1c0] sm:$0xf]  ;;  %v2949_v31 = vld [vmem:[#allocation10 + $0x148] sm:$0xf] }
 0x1c5   :  { %v1233_v43 = vmax.f32 %v1206_v37, 0.0  ;;  %v1076_v2 = vadd.f32 %v1075_v41, %v1027_v33 }
 0x1c8   :  { %v1158_v57 = vpop.f32.mrf.mxu2 }
 0x1c9   :  { %v1207_v51 = vpop.f32.mrf.mxu3  ;;  %v1159_v53 = vadd.f32 %v1158_v57, %v1110_v39  ;;  %v1123_v39 = vadd.f32 %v1122_v21, %v1074_v32  ;;  %v1124_v57 = vpop.f32.mrf.mxu1  ;;  %v2951_v32 = vld [vmem:[#allocation10 + $0x168] sm:$0xf0] }
 0x1ca   :  { %v1125_v37 = vadd.f32 %v1124_v57, %v1076_v2  ;;  %v2909_v2 = vld [vmem:[#allocation10 + $0x100] sm:$0xf] }
 0x1cb   :  { %v1208_v58 = vadd.f32 %v1207_v51, %v1159_v53  ;;  %v3151_v57 = vld [vmem:[#allocation10 + $0x11c] sm:$0xf0] }
 0x1cd   :  { %v1234_v4 = vmax.f32 %v1208_v58, 0.0 }
 0x1cf   :  { %v1245_v59 = vpack.c.bf16 %v1234_v4, %v1233_v43  ;;  %v3175_v4 = vld [vmem:[#allocation10 + $0x1dc] sm:$0xf0] }
 0x1d0   :  { %v1161_v8 = vpop.f32.mrf.mxu2  ;;  %v3006_v54 = vor.u32 %v3175_v4, %v3005_v38 }
 0x1d1   :  { %v1210_v62 = vpop.f32.mrf.mxu3  ;;  %1345 = vmatmul.bf16.gmra.mxu0 %v1245_v59  ;;  %v1162_v55 = vadd.f32 %v1161_v8, %v1113_v50  ;;  %v3010_v59 = vor.u32 %v3171_v52, %v3007_v56  ;;  %v3013_v8 = vld [vmem:[#allocation10 + $0x1c8] sm:$0xf] }
 0x1d2   :  { %1917 = vmatpush.bf16.msrb.mxu2 %v3006_v54 }
 0x1d3   :  { %v1211_v17 = vadd.f32 %v1210_v62, %v1162_v55  ;;  %v3176_v62 = vld [vmem:[#allocation10 + $0x1e4] sm:$0xf0]  ;;  %1966 = vmatpush.bf16.msrb.mxu3 %v3010_v59  ;;  %v2877_v59 = vld [vmem:[#allocation10 + $0xc0] sm:$0xf] }
 0x1d4   :  { %v3014_v50 = vor.u32 %v3176_v62, %v3013_v8  ;;  %v3143_v8 = vld [vmem:[#allocation10 + $0xdc] sm:$0xf0]  ;;  %v3139_v62 = vld [vmem:[#allocation10 + $0xc4] sm:$0xf] }
 0x1d5   :  { %v1235_v12 = vmax.f32 %v1211_v17, 0.0  ;;  %v2878_v63 = vor.u32 %v3143_v8, %v2877_v59 }
 0x1d6   :  { %2015 = vmatpush.bf16.msrb.mxu0 %v3014_v50  ;;  %v2879_v50 = vld [vmem:[#allocation10 + $0xe0] sm:$0xf0] }
 0x1d7   :  { %v2882_v10 = vor.u32 %v3139_v62, %v2879_v50  ;;  %v3021_v50 = vld [vmem:[#allocation10 + $0x1d0] sm:$0xf] }
 0x1d8   :  { %v1163_v7 = vpop.f32.mrf.mxu2 }
 0x1d9   :  { %v1212_v15 = vpop.f32.mrf.mxu3  ;;  %v1164_v6 = vadd.f32 %v1163_v7, %v1115_v30  ;;  %v3615_v30 = vld [vmem:[%s3898_s4] ss:$0 sm:$0xff] }
 0x1db   :  { %v1213_v9 = vadd.f32 %v1212_v15, %v1164_v6 }
 0x1dd   :  { %v1236_v22 = vmax.f32 %v1213_v9, 0.0  ;;  %v3163_v9 = vld [vmem:[#allocation10 + $0x184] sm:$0xf] }
 0x1df   :  { %v1246_v18 = vpack.c.bf16 %v1236_v22, %v1235_v12  ;;  %v2974_v12 = vor.u32 %v3167_v60, %v2973_v0  ;;  %v2975_v22 = vld [vmem:[#allocation10 + $0x1a0] sm:$0xf0] }
 0x1e0   :  { %v1166_v16 = vpop.f32.mrf.mxu2  ;;  %v2978_v3 = vor.u32 %v3163_v9, %v2975_v22 }
 0x1e1   :  { %v1215_v14 = vpop.f32.mrf.mxu3  ;;  %1350 = vmatmul.bf16.gmra.mxu0 %v1246_v18  ;;  %v1167_v29 = vadd.f32 %v1166_v16, %v1118_v19  ;;  %1918 = vmatpush.bf16.msrb.mxu2 %v2974_v12  ;;  %v2982_v18 = vor.u32 %v3168_v28, %v2981_v13  ;;  %v2983_v16 = vld [vmem:[#allocation10 + $0x1a8] sm:$0xf0]  ;;  %v3135_v13 = vld [vmem:[#allocation10 + $0x9c] sm:$0xf0]  ;;  %v3131_v28 = vld [vmem:[#allocation10 + $0x84] sm:$0xf] }
 0x1e2   :  { %1967 = vmatpush.bf16.msrb.mxu3 %v2978_v3  ;;  %v2845_v3 = vld [vmem:[#allocation10 + $0x80] sm:$0xf] }
 0x1e3   :  { %v1216_v24 = vadd.f32 %v1215_v14, %v1167_v29  ;;  %v2986_v14 = vor.u32 %v3164_v11, %v2983_v16  ;;  %2016 = vmatpush.bf16.msrb.mxu0 %v2982_v18  ;;  %v2846_v11 = vor.u32 %v3135_v13, %v2845_v3  ;;  %v2847_v18 = vld [vmem:[#allocation10 + $0xa0] sm:$0xf0]  ;;  %v3169_v13 = vld [vmem:[#allocation10 + $0x1ac] sm:$0xf0] }
 0x1e4   :  { %v2850_v16 = vor.u32 %v3131_v28, %v2847_v18  ;;  %v3165_v28 = vld [vmem:[#allocation10 + $0x194] sm:$0xf] }
 0x1e5   :  { %v1237_v46 = vmax.f32 %v1216_v24, 0.0  ;;  %2065 = vmatpush.bf16.msrb.mxu1 %v2986_v14  ;;  %v2853_v14 = vld [vmem:[#allocation10 + $0x88] sm:$0xf]  ;;  %v2991_v18 = vld [vmem:[#allocation10 + $0x1b0] sm:$0xf0] }
 0x1e8   :  { %v1168_v20 = vpop.f32.mrf.mxu2 }
 0x1e9   :  { %v1217_v42 = vpop.f32.mrf.mxu3  ;;  %v1169_v25 = vadd.f32 %v1168_v20, %v1120_v26  ;;  %v2941_v26 = vld [vmem:[#allocation10 + $0x140] sm:$0xf] }
 0x1ea   :  { %v3159_v20 = vld [vmem:[#allocation10 + $0x15c] sm:$0xf0] }
 0x1eb   :  { %v1218_v44 = vadd.f32 %v1217_v42, %v1169_v25  ;;  %v3155_v42 = vld [vmem:[#allocation10 + $0x144] sm:$0xf]  ;;  %v2942_v24 = vor.u32 %v3159_v20, %v2941_v26 }
 0x1ec   :  { %v2943_v25 = vld [vmem:[#allocation10 + $0x160] sm:$0xf0] }
 0x1ed   :  { %v1238_v27 = vmax.f32 %v1218_v44, 0.0  ;;  %v2946_v21 = vor.u32 %v3155_v42, %v2943_v25  ;;  %v3160_v44 = vld [vmem:[#allocation10 + $0x164] sm:$0xf0]  ;;  %1919 = vmatpush.bf16.msrb.mxu2 %v2942_v24 }
 0x1ef   :  { %v1247_v49 = vpack.c.bf16 %v1238_v27, %v1237_v46  ;;  %v3156_v46 = vld [vmem:[#allocation10 + $0x14c] sm:$0xf]  ;;  %v2950_v27 = vor.u32 %v3160_v44, %v2949_v31  ;;  %1968 = vmatpush.bf16.msrb.mxu3 %v2946_v21  ;;  %v2813_v21 = vld [vmem:[#allocation10 + $0x40] sm:$0xf]  ;;  %v3123_v44 = vld [vmem:[#allocation10 + $0x44] sm:$0xf] }
 0x1f0   :  { %v1171_v34 = vpop.f32.mrf.mxu2  ;;  %v2954_v33 = vor.u32 %v3156_v46, %v2951_v32  ;;  %v3127_v31 = vld [vmem:[#allocation10 + $0x5c] sm:$0xf0] }
 0x1f1   :  { %v1220_v35 = vpop.f32.mrf.mxu3  ;;  %1355 = vmatmul.bf16.gmra.mxu0 %v1247_v49  ;;  %v1172_v51 = vadd.f32 %v1171_v34, %v1123_v39  ;;  %v2814_v46 = vor.u32 %v3127_v31, %v2813_v21 }
 0x1f2   :  { %2017 = vmatpush.bf16.msrb.mxu0 %v2950_v27  ;;  %2066 = vmatpush.bf16.msrb.mxu1 %v2954_v33  ;;  %v2815_v27 = vld [vmem:[#allocation10 + $0x60] sm:$0xf0]  ;;  %v2821_v33 = vld [vmem:[#allocation10 + $0x48] sm:$0xf] }
 0x1f3   :  { %v1221_v48 = vadd.f32 %v1220_v35, %v1172_v51  ;;  %v3147_v51 = vld [vmem:[#allocation10 + $0x104] sm:$0xf]  ;;  %v2818_v32 = vor.u32 %v3123_v44, %v2815_v27  ;;  %v3161_v27 = vld [vmem:[#allocation10 + $0x16c] sm:$0xf0] }
 0x1f5   :  { %v1239_v58 = vmax.f32 %v1221_v48, 0.0 }
 0x1f8   :  { %v1173_v53 = vpop.f32.mrf.mxu2 }
 0x1f9   :  { %v1174_v23 = vadd.f32 %v1173_v53, %v1125_v37  ;;  %v1222_v45 = vpop.f32.mrf.mxu3  ;;  %v2910_v37 = vor.u32 %v3151_v57, %v2909_v2  ;;  %v2911_v53 = vld [vmem:[#allocation10 + $0x120] sm:$0xf0]  ;;  %v3119_v2 = vld [vmem:[#allocation10 + $0x1c] sm:$0xf0] }
 0x1fa   :  { %v2914_v48 = vor.u32 %v3147_v51, %v2911_v53  ;;  %v2783_v53 = vld [vmem:[#allocation10 + $0x20] sm:$0xf0] }
 0x1fb   :  { %v1223_v1 = vadd.f32 %v1222_v45, %v1174_v23  ;;  %v2917_v23 = vld [vmem:[#allocation10 + $0x108] sm:$0xf]  ;;  %1920 = vmatpush.bf16.msrb.mxu2 %v2910_v37  ;;  %v3115_v37 = vld [vmem:[#allocation10 + $0x4] sm:$0xf] }
 0x1fc   :  { %v3152_v45 = vld [vmem:[#allocation10 + $0x124] sm:$0xf0]  ;;  %1969 = vmatpush.bf16.msrb.mxu3 %v2914_v48 }
 0x1fd   :  { %v1240_v43 = vmax.f32 %v1223_v1, 0.0  ;;  %v3148_v1 = vld [vmem:[#allocation10 + $0x10c] sm:$0xf] }
 0x1ff   :  { %v1248_v40 = vpack.c.bf16 %v1240_v43, %v1239_v58  ;;  %v2918_v58 = vor.u32 %v3152_v45, %v2917_v23  ;;  %v2919_v43 = vld [vmem:[#allocation10 + $0x128] sm:$0xf0]  ;;  %1921 = vmatpush.bf16.msrb.mxu2 %v2878_v63  ;;  %v2786_v23 = vor.u32 %v3115_v37, %v2783_v53 }
 0x200   :  { %1970 = vmatpush.bf16.msrb.mxu3 %v2882_v10  ;;  %v3177_v10 = vld [vmem:[#allocation10 + $0x1ec] sm:$0xf0] }
 0x201   :  { %1360 = vmatmul.bf16.gmra.mxu0 %v1248_v40  ;;  %v2922_v40 = vor.u32 %v3148_v1, %v2919_v43 }
 0x202   :  { %2018 = vmatpush.bf16.msrb.mxu0 %v2918_v58 }
 0x203   :  { %2067 = vmatpush.bf16.msrb.mxu1 %v2922_v40  ;;  %1922 = vmatpush.bf16.msrb.mxu2 %v2846_v11  ;;  %v2789_v40 = vld [vmem:[#allocation10 + $0x8] sm:$0xf] }
 0x204   :  { %1971 = vmatpush.bf16.msrb.mxu3 %v2850_v16  ;;  %v2994_v16 = vor.u32 %v3165_v28, %v2991_v18  ;;  %v2903_v18 = vld [vmem:[#allocation10 + $0xf8] sm:$0xf0] }
 0x207   :  { %1923 = vmatpush.bf16.msrb.mxu2 %v2814_v46  ;;  %v2957_v46 = vld [vmem:[#allocation10 + $0x150] sm:$0xf] }
 0x208   :  { %1972 = vmatpush.bf16.msrb.mxu3 %v2818_v32  ;;  %v3157_v32 = vld [vmem:[#allocation10 + $0x154] sm:$0xf] }
 0x20c   :  { %1973 = vmatpush.bf16.msrb.mxu3 %v2786_v23 }
 0x20e   :  { %v1326_v55 = vpop.f32.mrf.mxu0 }
 0x20f   :  { %v1327_v15 = vadd.f32 %v3615_v30, %v1326_v55  ;;  %v3144_v55 = vld [vmem:[#allocation10 + $0xe4] sm:$0xf0] }
 0x216   :  { %v1328_v7 = vpop.f32.mrf.mxu0 }
 0x217   :  { %v1329_v17 = vadd.f32 %v3615_v30, %v1328_v7  ;;  %v3140_v7 = vld [vmem:[#allocation10 + $0xcc] sm:$0xf] }
 0x219   :  { %v1366_v6 = vpack.c.bf16 %v1329_v17, %v1327_v15  ;;  %v2886_v15 = vor.u32 %v3144_v55, %v2885_v5  ;;  %v2887_v17 = vld [vmem:[#allocation10 + $0xe8] sm:$0xf0]  ;;  %v3173_v5 = vld [vmem:[#allocation10 + $0x1d4] sm:$0xf] }
 0x21b   :  { %1450 = vmatmul.bf16.vlgmr.msra.gmra.mxu1 %v1366_v6  ;;  %v2890_v6 = vor.u32 %v3140_v7, %v2887_v17  ;;  %2019 = vmatpush.bf16.msrb.mxu0 %v2886_v15  ;;  %v3022_v7 = vor.u32 %v3177_v10, %v3021_v50  ;;  %v3023_v15 = vld [vmem:[#allocation10 + $0x1f0] sm:$0xf0] }
 0x21c   :  { %v3026_v17 = vor.u32 %v3173_v5, %v3023_v15 }
 0x21d   :  { %2068 = vmatpush.bf16.msrb.mxu1 %v2890_v6  ;;  %v3029_v6 = vld [vmem:[#allocation10 + $0x1d8] sm:$0xf] }
 0x21e   :  { %v1331_v47 = vpop.f32.mrf.mxu0  ;;  %2162 = vmatpush.bf16.msra.mxu3 %v3026_v17 }
 0x21f   :  { %v1332_v36 = vadd.f32 %v3615_v30, %v1331_v47  ;;  %v3136_v47 = vld [vmem:[#allocation10 + $0xa4] sm:$0xf0] }
 0x222   :  { %2163 = vmatpush.bf16.msra.mxu3 %v2994_v16 }
 0x226   :  { %v1333_v19 = vpop.f32.mrf.mxu0 }
 0x227   :  { %v1334_v61 = vadd.f32 %v3615_v30, %v1333_v19  ;;  %v3132_v19 = vld [vmem:[#allocation10 + $0x8c] sm:$0xf] }
 0x229   :  { %v1367_v29 = vpack.c.bf16 %v1334_v61, %v1332_v36  ;;  %v2854_v36 = vor.u32 %v3136_v47, %v2853_v14  ;;  %v2855_v61 = vld [vmem:[#allocation10 + $0xa8] sm:$0xf0]  ;;  %v3636_v14 = vld [vmem:[%s3900_s6] ss:$0 sm:$0xff]  ;;  %v2997_v47 = vld [vmem:[#allocation10 + $0x198] sm:$0xf] }
 0x22a   :  { %s3399_s6 = smov [#allocation13]  }
 0x22b   :  { %1455 = vmatmul.bf16.gmra.mxu1 %v1367_v29  ;;  %v2858_v29 = vor.u32 %v3132_v19, %v2855_v61  ;;  %2020 = vmatpush.bf16.msrb.mxu0 %v2854_v36  ;;  %v3170_v19 = vld [vmem:[#allocation10 + $0x1b4] sm:$0xf0]  ;;  %v3166_v61 = vld [vmem:[#allocation10 + $0x19c] sm:$0xf]  ;;  %s2441_s22 = sshll.u32 %s3399_s6, 4  ;;  %s2442_s22 = int_to_ptr.vmem [resolvable:$true] %s2441_s22 }
 0x22c   :  { %v2998_v36 = vor.u32 %v3170_v19, %v2997_v47 }
 0x22d   :  { %2069 = vmatpush.bf16.msrb.mxu1 %v2858_v29  ;;  %v2999_v29 = vld [vmem:[#allocation10 + $0x1b8] sm:$0xf0] }
 0x22e   :  { %v1336_v41 = vpop.f32.mrf.mxu0 }
 0x22f   :  { %v1337_v34 = vadd.f32 %v3615_v30, %v1336_v41  ;;  %v3128_v41 = vld [vmem:[#allocation10 + $0x64] sm:$0xf0] }
 0x236   :  { %v1338_v49 = vpop.f32.mrf.mxu0 }
 0x237   :  { %v1339_v35 = vadd.f32 %v3615_v30, %v1338_v49  ;;  %v3124_v49 = vld [vmem:[#allocation10 + $0x4c] sm:$0xf] }
 0x239   :  { %v1368_v39 = vpack.c.bf16 %v1339_v35, %v1337_v34  ;;  %v2822_v34 = vor.u32 %v3128_v41, %v2821_v33  ;;  %v2823_v35 = vld [vmem:[#allocation10 + $0x68] sm:$0xf0]  ;;  %v2958_v33 = vor.u32 %v3161_v27, %v2957_v46  ;;  %v2959_v41 = vld [vmem:[#allocation10 + $0x170] sm:$0xf0]  ;;  %v2869_v27 = vld [vmem:[#allocation10 + $0x98] sm:$0xf] }
 0x23a   :  { %v2826_v57 = vor.u32 %v3124_v49, %v2823_v35  ;;  %v2962_v49 = vor.u32 %v3157_v32, %v2959_v41  ;;  %v3162_v35 = vld [vmem:[#allocation10 + $0x174] sm:$0xf0]  ;;  %v3134_v41 = vld [vmem:[#allocation10 + $0x9c] sm:$0xf] }
 0x23b   :  { %1460 = vmatmul.bf16.gmra.mxu1 %v1368_v39  ;;  %v2781_v39 = vld [vmem:[#allocation10] sm:$0xf]  ;;  %2021 = vmatpush.bf16.msrb.mxu0 %v2822_v34  ;;  %v2965_v34 = vld [vmem:[#allocation10 + $0x158] sm:$0xf] }
 0x23c   :  { %v2782_v51 = vor.u32 %v3119_v2, %v2781_v39  ;;  %2070 = vmatpush.bf16.msrb.mxu1 %v2826_v57  ;;  %2164 = vmatpush.bf16.msra.mxu3 %v2962_v49  ;;  %v2966_v39 = vor.u32 %v3162_v35, %v2965_v34  ;;  %v3158_v2 = vld [vmem:[#allocation10 + $0x15c] sm:$0xf]  ;;  %v3138_v32 = vld [vmem:[#allocation10 + $0xb4] sm:$0xf0] }
 0x23d   :  { %v2967_v57 = vld [vmem:[#allocation10 + $0x178] sm:$0xf0] }
 0x23e   :  { %v1341_v38 = vpop.f32.mrf.mxu0  ;;  %1924 = vmatpush.bf16.msrb.mxu2 %v2782_v51  ;;  %v2970_v51 = vor.u32 %v3158_v2, %v2967_v57  ;;  %v2871_v49 = vld [vmem:[#allocation10 + $0xb8] sm:$0xf0] }
 0x23f   :  { %v1342_v52 = vadd.f32 %v3615_v30, %v1341_v38  ;;  %v3120_v38 = vld [vmem:[#allocation10 + $0x24] sm:$0xf0]  ;;  %v2874_v34 = vor.u32 %v3134_v41, %v2871_v49 }
 0x242   :  { %2113 = vmatpush.bf16.msra.mxu2 %v3022_v7 }
 0x246   :  { %v1343_v4 = vpop.f32.mrf.mxu0 }
 0x247   :  { %v1344_v54 = vadd.f32 %v3615_v30, %v1343_v4  ;;  %v3116_v4 = vld [vmem:[#allocation10 + $0xc] sm:$0xf] }
 0x249   :  { %v1369_v56 = vpack.c.bf16 %v1344_v54, %v1342_v52  ;;  %v2790_v52 = vor.u32 %v3120_v38, %v2789_v40  ;;  %v2791_v54 = vld [vmem:[#allocation10 + $0x28] sm:$0xf0]  ;;  %v3153_v40 = vld [vmem:[#allocation10 + $0x12c] sm:$0xf0]  ;;  %v3149_v38 = vld [vmem:[#allocation10 + $0x114] sm:$0xf] }
 0x24b   :  { %1465 = vmatmul.bf16.gmra.mxu1 %v1369_v56  ;;  %v2794_v56 = vor.u32 %v3116_v4, %v2791_v54  ;;  %2022 = vmatpush.bf16.msrb.mxu0 %v2790_v52  ;;  %v2927_v52 = vld [vmem:[#allocation10 + $0x130] sm:$0xf0] }
 0x24c   :  { %v2930_v54 = vor.u32 %v3149_v38, %v2927_v52  ;;  %v2837_v38 = vld [vmem:[#allocation10 + $0x58] sm:$0xf] }
 0x24d   :  { %2071 = vmatpush.bf16.msrb.mxu1 %v2794_v56  ;;  %v2933_v56 = vld [vmem:[#allocation10 + $0x118] sm:$0xf] }
 0x24e   :  { %v1346_v0 = vpop.f32.mrf.mxu0  ;;  %2165 = vmatpush.bf16.msra.mxu3 %v2930_v54  ;;  %v3126_v54 = vld [vmem:[#allocation10 + $0x5c] sm:$0xf] }
 0x24f   :  { %v1347_v9 = vadd.f32 %v3615_v30, %v1346_v0  ;;  %v3178_v0 = vld [vmem:[#allocation10 + $0x1f4] sm:$0xf0] }
 0x256   :  { %v1348_v60 = vpop.f32.mrf.mxu0 }
 0x257   :  { %v1349_v12 = vadd.f32 %v3615_v30, %v1348_v60  ;;  %v3174_v60 = vld [vmem:[#allocation10 + $0x1dc] sm:$0xf] }
 0x259   :  { %v1370_v22 = vpack.c.bf16 %v1349_v12, %v1347_v9  ;;  %v3030_v9 = vor.u32 %v3178_v0, %v3029_v6  ;;  %v3031_v12 = vld [vmem:[#allocation10 + $0x1f8] sm:$0xf0]  ;;  %v2893_v0 = vld [vmem:[#allocation10 + $0xd0] sm:$0xf] }
 0x25b   :  { %1470 = vmatmul.bf16.gmra.mxu1 %v1370_v22  ;;  %v3034_v22 = vor.u32 %v3174_v60, %v3031_v12  ;;  %2211 = vmatpush.bf16.msra.mxu0 %v3030_v9  ;;  %v3145_v60 = vld [vmem:[#allocation10 + $0xec] sm:$0xf0]  ;;  %v3141_v9 = vld [vmem:[#allocation10 + $0xd4] sm:$0xf] }
 0x25c   :  { %v2894_v12 = vor.u32 %v3145_v60, %v2893_v0  ;;  %v2799_v60 = vld [vmem:[#allocation10 + $0x30] sm:$0xf0] }
 0x25d   :  { %2260 = vmatpush.bf16.msra.mxu1 %v3034_v22  ;;  %v2895_v22 = vld [vmem:[#allocation10 + $0xf0] sm:$0xf0] }
 0x25e   :  { %v1351_v26 = vpop.f32.mrf.mxu0 }
 0x25f   :  { %v1352_v42 = vadd.f32 %v3615_v30, %v1351_v26  ;;  %v3002_v26 = vor.u32 %v3166_v61, %v2999_v29  ;;  %2212 = vmatpush.bf16.msra.mxu0 %v2998_v36 }
 0x261   :  { %2261 = vmatpush.bf16.msra.mxu1 %v3002_v26 }
 0x263   :  { %2213 = vmatpush.bf16.msra.mxu0 %v2966_v39 }
 0x265   :  { %2262 = vmatpush.bf16.msra.mxu1 %v2970_v51 }
 0x266   :  { %v1353_v20 = vpop.f32.mrf.mxu0 }
 0x267   :  { %v1354_v24 = vadd.f32 %v3615_v30, %v1353_v20 }
 0x269   :  { %v1371_v25 = vpack.c.bf16 %v1354_v24, %v1352_v42 }
 0x26b   :  { %1475 = vmatmul.bf16.gmra.mxu1 %v1371_v25 }
 0x26e   :  { %v1356_v48 = vpop.f32.mrf.mxu0 }
 0x26f   :  { %v1357_v1 = vadd.f32 %v3615_v30, %v1356_v48 }
 0x276   :  { %v1358_v45 = vpop.f32.mrf.mxu0 }
 0x277   :  { %v1359_v58 = vadd.f32 %v3615_v30, %v1358_v45 }
 0x279   :  { %v1372_v43 = vpack.c.bf16 %v1359_v58, %v1357_v1 }
 0x27b   :  { %1480 = vmatmul.bf16.gmra.mxu1 %v1372_v43  ;;  %v2925_v43 = vld [vmem:[#allocation10 + $0x110] sm:$0xf] }
 0x27c   :  { %v2926_v4 = vor.u32 %v3153_v40, %v2925_v43  ;;  %v2831_v43 = vld [vmem:[#allocation10 + $0x70] sm:$0xf0] }
 0x27e   :  { %v1361_v59 = vpop.f32.mrf.mxu0 }
 0x27f   :  { %v1362_v62 = vadd.f32 %v3615_v30, %v1361_v59  ;;  %v3154_v59 = vld [vmem:[#allocation10 + $0x134] sm:$0xf0] }
 0x286   :  { %v1363_v8 = vpop.f32.mrf.mxu0 }
 0x287   :  { %v1364_v63 = vadd.f32 %v3615_v30, %v1363_v8  ;;  %v2989_v30 = vld [vmem:[#allocation10 + $0x190] sm:$0xf]  ;;  %v2934_v8 = vor.u32 %v3154_v59, %v2933_v56  ;;  %v2839_v56 = vld [vmem:[#allocation10 + $0x78] sm:$0xf0] }
 0x288   :  { %v2990_v11 = vor.u32 %v3169_v13, %v2989_v30  ;;  %v2901_v30 = vld [vmem:[#allocation10 + $0xd8] sm:$0xf]  ;;  %v2842_v59 = vor.u32 %v3126_v54, %v2839_v56 }
 0x289   :  { %v1373_v55 = vpack.c.bf16 %v1364_v63, %v1362_v62  ;;  %v3150_v62 = vld [vmem:[#allocation10 + $0x11c] sm:$0xf]  ;;  %2214 = vmatpush.bf16.msra.mxu0 %v2934_v8  ;;  %v3146_v13 = vld [vmem:[#allocation10 + $0xf4] sm:$0xf0] }
 0x28a   :  { %2114 = vmatpush.bf16.msra.mxu2 %v2990_v11  ;;  %v2935_v63 = vld [vmem:[#allocation10 + $0x138] sm:$0xf0]  ;;  %v2902_v28 = vor.u32 %v3146_v13, %v2901_v30 }
 0x28b   :  { %1485 = vmatmul.bf16.gmra.mxu1 %v1373_v55  ;;  %v2938_v50 = vor.u32 %v3150_v62, %v2935_v63  ;;  %v3142_v11 = vld [vmem:[#allocation10 + $0xdc] sm:$0xf] }
 0x28c   :  { %v2906_v16 = vor.u32 %v3142_v11, %v2903_v18  ;;  %v3118_v30 = vld [vmem:[#allocation10 + $0x1c] sm:$0xf] }
 0x28d   :  { %2263 = vmatpush.bf16.msra.mxu1 %v2938_v50  ;;  %2215 = vmatpush.bf16.msra.mxu0 %v2902_v28  ;;  %v2807_v13 = vld [vmem:[#allocation10 + $0x38] sm:$0xf0] }
 0x28e   :  { %2115 = vmatpush.bf16.msra.mxu2 %v2958_v33  ;;  %v2870_v33 = vor.u32 %v3138_v32, %v2869_v27  ;;  %v2810_v28 = vor.u32 %v3118_v30, %v2807_v13 }
 0x291   :  { %2264 = vmatpush.bf16.msra.mxu1 %v2906_v16  ;;  %2216 = vmatpush.bf16.msra.mxu0 %v2870_v33 }
 0x292   :  { %2116 = vmatpush.bf16.msra.mxu2 %v2926_v4  ;;  %v3130_v4 = vld [vmem:[#allocation10 + $0x74] sm:$0xf0] }
 0x293   :  { %v2838_v52 = vor.u32 %v3130_v4, %v2837_v38 }
 0x295   :  { %2265 = vmatpush.bf16.msra.mxu1 %v2874_v34  ;;  %2217 = vmatpush.bf16.msra.mxu0 %v2838_v52 }
 0x296   :  { %2117 = vmatpush.bf16.msra.mxu2 %v2894_v12  ;;  %v3122_v12 = vld [vmem:[#allocation10 + $0x34] sm:$0xf0] }
 0x298   :  { %v1451_v3 = vpop.f32.mrf.mxu1 }
 0x299   :  { %v1452_v20 = vadd.f32 %v3636_v14, %v1451_v3  ;;  %v2898_v3 = vor.u32 %v3141_v9, %v2895_v22  ;;  %2266 = vmatpush.bf16.msra.mxu1 %v2842_v59  ;;  %v2805_v9 = vld [vmem:[#allocation10 + $0x18] sm:$0xf] }
 0x29b   :  { %v1491_v25 = vmax.f32 %v1452_v20, 0.0  ;;  %2166 = vmatpush.bf16.msra.mxu3 %v2898_v3  ;;  %v2806_v3 = vor.u32 %v3122_v12, %v2805_v9 }
 0x29d   :  { %2218 = vmatpush.bf16.msra.mxu0 %v2806_v3  ;;  %2267 = vmatpush.bf16.msra.mxu1 %v2810_v28 }
 0x2a0   :  { %v1453_v42 = vpop.f32.mrf.mxu1 }
 0x2a1   :  { %v1454_v24 = vadd.f32 %v3636_v14, %v1453_v42  ;;  %v2861_v42 = vld [vmem:[#allocation10 + $0x90] sm:$0xf] }
 0x2a3   :  { %v1492_v21 = vmax.f32 %v1454_v24, 0.0  ;;  %v3137_v24 = vld [vmem:[#allocation10 + $0xac] sm:$0xf0] }
 0x2a5   :  { %v3640_v31 = vpack.c.bf16 %v1492_v21, %v1491_v25  ;;  %v3133_v25 = vld [vmem:[#allocation10 + $0x94] sm:$0xf]  ;;  %v2862_v21 = vor.u32 %v3137_v24, %v2861_v42 }
 0x2a7   :  { %1925 = vmatmul.bf16.vlgmr.msrb.gmra.mxu2 %v3640_v31  ;;  %1974 = vmatmul.bf16.vlgmr.msrb.gmra.mxu3 %v3640_v31 }
 0x2a8   :  { %2023 = vmatmul.bf16.vlgmr.msrb.gmra.mxu0 %v3640_v31  ;;  %2072 = vmatmul.bf16.vlgmr.msrb.gmra.mxu1 %v3640_v31  ;;  %v1456_v44 = vpop.f32.mrf.mxu1 }
 0x2a9   :  { %v1457_v37 = vadd.f32 %v3636_v14, %v1456_v44  ;;  %v2863_v44 = vld [vmem:[#allocation10 + $0xb0] sm:$0xf0]  ;;  %2118 = vmatpush.bf16.msra.mxu2 %v2862_v21 }
 0x2aa   :  { %v2866_v46 = vor.u32 %v3133_v25, %v2863_v44  ;;  %v3702_v44 = vld [vmem:[#allocation11] sm:$0xff] }
 0x2ab   :  { %v1493_v23 = vmax.f32 %v1457_v37, 0.0  ;;  %v3708_v27 = vperm.slane %v3702_v44, 3  ;;  %v3715_v49 = vperm.slane %v3702_v44, 0  ;;  %v3718_v34 = vperm.slane %v3702_v44, 1 }
 0x2ac   :  { %2167 = vmatpush.bf16.msra.mxu3 %v2866_v46  ;;  %v3705_v46 = vperm.slane %v3702_v44, 2 }
 0x2b0   :  { %v1458_v53 = vpop.f32.mrf.mxu1 }
 0x2b1   :  { %v1459_v48 = vadd.f32 %v3636_v14, %v1458_v53 }
 0x2b3   :  { %v1494_v45 = vmax.f32 %v1459_v48, 0.0  ;;  %v2829_v48 = vld [vmem:[#allocation10 + $0x50] sm:$0xf] }
 0x2b5   :  { %v3648_v1 = vpack.c.bf16 %v1494_v45, %v1493_v23  ;;  %v3129_v23 = vld [vmem:[#allocation10 + $0x6c] sm:$0xf0]  ;;  %v3125_v45 = vld [vmem:[#allocation10 + $0x54] sm:$0xf] }
 0x2b6   :  { %v2834_v40 = vor.u32 %v3125_v45, %v2831_v43 }
 0x2b7   :  { %1930 = vmatmul.bf16.gmra.mxu2 %v3648_v1  ;;  %1979 = vmatmul.bf16.gmra.mxu3 %v3648_v1 }
 0x2b8   :  { %2028 = vmatmul.bf16.gmra.mxu0 %v3648_v1  ;;  %2077 = vmatmul.bf16.gmra.mxu1 %v3648_v1  ;;  %v1461_v58 = vpop.f32.mrf.mxu1 }
 0x2b9   :  { %v1462_v10 = vadd.f32 %v3636_v14, %v1461_v58  ;;  %v2830_v58 = vor.u32 %v3129_v23, %v2829_v48  ;;  %2168 = vmatpush.bf16.msra.mxu3 %v2834_v40 }
 0x2bb   :  { %v1495_v7 = vmax.f32 %v1462_v10, 0.0  ;;  %2119 = vmatpush.bf16.msra.mxu2 %v2830_v58 }
 0x2c0   :  { %v1463_v5 = vpop.f32.mrf.mxu1 }
 0x2c1   :  { %v1464_v55 = vadd.f32 %v3636_v14, %v1463_v5 }
 0x2c3   :  { %v1496_v15 = vmax.f32 %v1464_v55, 0.0 }
 0x2c5   :  { %v3656_v17 = vpack.c.bf16 %v1496_v15, %v1495_v7  ;;  %v2797_v7 = vld [vmem:[#allocation10 + $0x10] sm:$0xf] }
 0x2c6   :  { %v3121_v15 = vld [vmem:[#allocation10 + $0x2c] sm:$0xf0] }
 0x2c7   :  { %1935 = vmatmul.bf16.gmra.mxu2 %v3656_v17  ;;  %1984 = vmatmul.bf16.gmra.mxu3 %v3656_v17  ;;  %v2798_v0 = vor.u32 %v3121_v15, %v2797_v7 }
 0x2c8   :  { %2033 = vmatmul.bf16.gmra.mxu0 %v3656_v17  ;;  %2082 = vmatmul.bf16.gmra.mxu1 %v3656_v17  ;;  %v1466_v6 = vpop.f32.mrf.mxu1 }
 0x2c9   :  { %v1467_v47 = vadd.f32 %v3636_v14, %v1466_v6  ;;  %v3117_v6 = vld [vmem:[#allocation10 + $0x14] sm:$0xf]  ;;  %2120 = vmatpush.bf16.msra.mxu2 %v2798_v0 }
 0x2ca   :  { %v2802_v22 = vor.u32 %v3117_v6, %v2799_v60 }
 0x2cb   :  { %v1497_v61 = vmax.f32 %v1467_v47, 0.0 }
 0x2cc   :  { %2169 = vmatpush.bf16.msra.mxu3 %v2802_v22 }
 0x2d0   :  { %v1468_v19 = vpop.f32.mrf.mxu1 }
 0x2d1   :  { %v1469_v36 = vadd.f32 %v3636_v14, %v1468_v19 }
 0x2d3   :  { %v1498_v29 = vmax.f32 %v1469_v36, 0.0 }
 0x2d5   :  { %v3664_v26 = vpack.c.bf16 %v1498_v29, %v1497_v61 }
 0x2d7   :  { %1940 = vmatmul.bf16.gmra.mxu2 %v3664_v26  ;;  %1989 = vmatmul.bf16.gmra.mxu3 %v3664_v26 }
 0x2d8   :  { %2038 = vmatmul.bf16.gmra.mxu0 %v3664_v26  ;;  %2087 = vmatmul.bf16.gmra.mxu1 %v3664_v26  ;;  %v1471_v20 = vpop.f32.mrf.mxu1 }
 0x2d9   :  { %v1472_v35 = vadd.f32 %v3636_v14, %v1471_v20 }
 0x2db   :  { %v1499_v57 = vmax.f32 %v1472_v35, 0.0 }
 0x2e0   :  { %v1473_v39 = vpop.f32.mrf.mxu1 }
 0x2e1   :  { %v1474_v2 = vadd.f32 %v3636_v14, %v1473_v39 }
 0x2e3   :  { %v1500_v51 = vmax.f32 %v1474_v2, 0.0 }
 0x2e5   :  { %v3672_v37 = vpack.c.bf16 %v1500_v51, %v1499_v57 }
 0x2e7   :  { %1945 = vmatmul.bf16.gmra.mxu2 %v3672_v37  ;;  %1994 = vmatmul.bf16.gmra.mxu3 %v3672_v37 }
 0x2e8   :  { %2043 = vmatmul.bf16.gmra.mxu0 %v3672_v37  ;;  %2092 = vmatmul.bf16.gmra.mxu1 %v3672_v37  ;;  %v1476_v53 = vpop.f32.mrf.mxu1 }
 0x2e9   :  { %v1477_v8 = vadd.f32 %v3636_v14, %v1476_v53 }
 0x2eb   :  { %v1501_v50 = vmax.f32 %v1477_v8, 0.0 }
 0x2f0   :  { %v1478_v62 = vpop.f32.mrf.mxu1 }
 0x2f1   :  { %v1479_v63 = vadd.f32 %v3636_v14, %v1478_v62 }
 0x2f3   :  { %v1502_v10 = vmax.f32 %v1479_v63, 0.0 }
 0x2f5   :  { %v3680_v5 = vpack.c.bf16 %v1502_v10, %v1501_v50 }
 0x2f7   :  { %1950 = vmatmul.bf16.gmra.mxu2 %v3680_v5  ;;  %1999 = vmatmul.bf16.gmra.mxu3 %v3680_v5 }
 0x2f8   :  { %2048 = vmatmul.bf16.gmra.mxu0 %v3680_v5  ;;  %2097 = vmatmul.bf16.gmra.mxu1 %v3680_v5  ;;  %v1481_v55 = vpop.f32.mrf.mxu1 }
 0x2f9   :  { %v1482_v11 = vadd.f32 %v3636_v14, %v1481_v55 }
 0x2fb   :  { %v1503_v47 = vmax.f32 %v1482_v11, 0.0 }
 0x300   :  { %v1483_v18 = vpop.f32.mrf.mxu1 }
 0x301   :  { %v1484_v16 = vadd.f32 %v3636_v14, %v1483_v18 }
 0x303   :  { %v1504_v19 = vmax.f32 %v1484_v16, 0.0 }
 0x305   :  { %v3688_v36 = vpack.c.bf16 %v1504_v19, %v1503_v47 }
 0x307   :  { %1955 = vmatmul.bf16.gmra.mxu2 %v3688_v36  ;;  %2004 = vmatmul.bf16.gmra.mxu3 %v3688_v36 }
 0x308   :  { %2053 = vmatmul.bf16.gmra.mxu0 %v3688_v36  ;;  %2102 = vmatmul.bf16.gmra.mxu1 %v3688_v36  ;;  %v1486_v61 = vpop.f32.mrf.mxu1 }
 0x309   :  { %v1487_v29 = vadd.f32 %v3636_v14, %v1486_v61 }
 0x30b   :  { %v1505_v24 = vmax.f32 %v1487_v29, 0.0 }
 0x310   :  { %v1488_v20 = vpop.f32.mrf.mxu1 }
 0x311   :  { %v1489_v42 = vadd.f32 %v3636_v14, %v1488_v20 }
 0x313   :  { %v1506_v25 = vmax.f32 %v1489_v42, 0.0 }
 0x315   :  { %v3696_v21 = vpack.c.bf16 %v1506_v25, %v1505_v24 }
 0x317   :  { %1960 = vmatmul.bf16.gmra.mxu2 %v3696_v21  ;;  %2009 = vmatmul.bf16.gmra.mxu3 %v3696_v21 }
 0x318   :  { %2058 = vmatmul.bf16.gmra.mxu0 %v3696_v21  ;;  %2107 = vmatmul.bf16.gmra.mxu1 %v3696_v21 }
 0x325   :  { %v2024_v14 = vpop.f32.mrf.mxu0  ;;  %v2073_v32 = vpop.f32.mrf.mxu1 }
 0x326   :  { %v2025_v33 = vadd.f32 %v2024_v14, %v3705_v46  ;;  %v2074_v41 = vadd.f32 %v2073_v32, %v3708_v27 }
 0x327   :  { %2121 = vmatmul.bf16.vlgmr.msra.gmra.mxu2 %v3640_v31  ;;  %2170 = vmatmul.bf16.vlgmr.msra.gmra.mxu3 %v3640_v31 }
 0x328   :  { %2311 = vst [vmem:[#allocation13 + $0x10] sm:$0xff] %v2025_v33  ;;  %2219 = vmatmul.bf16.vlgmr.msra.gmra.mxu0 %v3640_v31  ;;  %2268 = vmatmul.bf16.vlgmr.msra.gmra.mxu1 %v3640_v31 }
 0x329   :  { %2312 = vst [vmem:[#allocation13 + $0x18] sm:$0xff] %v2074_v41 }
 0x32a   :  { %v1926_v35 = vpop.f32.mrf.mxu2  ;;  %v1975_v39 = vpop.f32.mrf.mxu3 }
 0x32b   :  { %v1927_v2 = vadd.f32 %v1926_v35, %v3715_v49  ;;  %v1976_v57 = vadd.f32 %v1975_v39, %v3718_v34 }
 0x32d   :  { %2309 = vst [vmem:[#allocation13] sm:$0xff] %v1927_v2  ;;  %v2026_v51 = vpop.f32.mrf.mxu0  ;;  %v2075_v53 = vpop.f32.mrf.mxu1 }
 0x32e   :  { %2310 = vst [vmem:[#allocation13 + $0x8] sm:$0xff] %v1976_v57  ;;  %v2027_v48 = vadd.f32 %v2026_v51, %v3705_v46  ;;  %v2076_v23 = vadd.f32 %v2075_v53, %v3708_v27 }
 0x330   :  { %2319 = vst [vmem:[#allocation13 + $0x50] sm:$0xff] %v2027_v48 }
 0x331   :  { %2320 = vst [vmem:[#allocation13 + $0x58] sm:$0xff] %v2076_v23 }
 0x332   :  { %v1928_v45 = vpop.f32.mrf.mxu2  ;;  %v1977_v58 = vpop.f32.mrf.mxu3 }
 0x333   :  { %v1929_v31 = vadd.f32 %v1928_v45, %v3715_v49  ;;  %v1978_v43 = vadd.f32 %v1977_v58, %v3718_v34 }
 0x335   :  { %2317 = vst [vmem:[#allocation13 + $0x40] sm:$0xff] %v1929_v31  ;;  %v2029_v40 = vpop.f32.mrf.mxu0  ;;  %v2078_v38 = vpop.f32.mrf.mxu1 }
 0x336   :  { %2318 = vst [vmem:[#allocation13 + $0x48] sm:$0xff] %v1978_v43  ;;  %v2030_v4 = vadd.f32 %v2029_v40, %v3705_v46  ;;  %v2079_v52 = vadd.f32 %v2078_v38, %v3708_v27 }
 0x337   :  { %2126 = vmatmul.bf16.gmra.mxu2 %v3648_v1  ;;  %2175 = vmatmul.bf16.gmra.mxu3 %v3648_v1 }
 0x338   :  { %2327 = vst [vmem:[#allocation13 + $0x90] sm:$0xff] %v2030_v4  ;;  %2224 = vmatmul.bf16.gmra.mxu0 %v3648_v1  ;;  %2273 = vmatmul.bf16.gmra.mxu1 %v3648_v1 }
 0x339   :  { %2328 = vst [vmem:[#allocation13 + $0x98] sm:$0xff] %v2079_v52 }
 0x33a   :  { %v1931_v54 = vpop.f32.mrf.mxu2  ;;  %v1980_v56 = vpop.f32.mrf.mxu3 }
 0x33b   :  { %v1932_v59 = vadd.f32 %v1931_v54, %v3715_v49  ;;  %v1981_v8 = vadd.f32 %v1980_v56, %v3718_v34 }
 0x33d   :  { %2325 = vst [vmem:[#allocation13 + $0x80] sm:$0xff] %v1932_v59  ;;  %v2031_v62 = vpop.f32.mrf.mxu0  ;;  %v2080_v63 = vpop.f32.mrf.mxu1 }
 0x33e   :  { %2326 = vst [vmem:[#allocation13 + $0x88] sm:$0xff] %v1981_v8  ;;  %v2032_v50 = vadd.f32 %v2031_v62, %v3705_v46  ;;  %v2081_v10 = vadd.f32 %v2080_v63, %v3708_v27 }
 0x340   :  { %2335 = vst [vmem:[#allocation13 + $0xd0] sm:$0xff] %v2032_v50 }
 0x341   :  { %2336 = vst [vmem:[#allocation13 + $0xd8] sm:$0xff] %v2081_v10 }
 0x342   :  { %v1933_v55 = vpop.f32.mrf.mxu2  ;;  %v1982_v7 = vpop.f32.mrf.mxu3 }
 0x343   :  { %v1934_v1 = vadd.f32 %v1933_v55, %v3715_v49  ;;  %v1983_v15 = vadd.f32 %v1982_v7, %v3718_v34 }
 0x345   :  { %2333 = vst [vmem:[#allocation13 + $0xc0] sm:$0xff] %v1934_v1  ;;  %v2034_v6 = vpop.f32.mrf.mxu0  ;;  %v2083_v0 = vpop.f32.mrf.mxu1 }
 0x346   :  { %2334 = vst [vmem:[#allocation13 + $0xc8] sm:$0xff] %v1983_v15  ;;  %v2035_v60 = vadd.f32 %v2034_v6, %v3705_v46  ;;  %v2084_v9 = vadd.f32 %v2083_v0, %v3708_v27 }
 0x347   :  { %2131 = vmatmul.bf16.gmra.mxu2 %v3656_v17  ;;  %2180 = vmatmul.bf16.gmra.mxu3 %v3656_v17 }
 0x348   :  { %2343 = vst [vmem:[#allocation13 + $0x110] sm:$0xff] %v2035_v60  ;;  %2229 = vmatmul.bf16.gmra.mxu0 %v3656_v17  ;;  %2278 = vmatmul.bf16.gmra.mxu1 %v3656_v17 }
 0x349   :  { %2344 = vst [vmem:[#allocation13 + $0x118] sm:$0xff] %v2084_v9 }
 0x34a   :  { %v1936_v12 = vpop.f32.mrf.mxu2  ;;  %v1985_v22 = vpop.f32.mrf.mxu3 }
 0x34b   :  { %v1937_v3 = vadd.f32 %v1936_v12, %v3715_v49  ;;  %v1986_v30 = vadd.f32 %v1985_v22, %v3718_v34 }
 0x34d   :  { %2341 = vst [vmem:[#allocation13 + $0x100] sm:$0xff] %v1937_v3  ;;  %v2036_v13 = vpop.f32.mrf.mxu0  ;;  %v2085_v28 = vpop.f32.mrf.mxu1 }
 0x34e   :  { %2342 = vst [vmem:[#allocation13 + $0x108] sm:$0xff] %v1986_v30  ;;  %v2037_v11 = vadd.f32 %v2036_v13, %v3705_v46  ;;  %v2086_v18 = vadd.f32 %v2085_v28, %v3708_v27 }
 0x350   :  { %2351 = vst [vmem:[#allocation13 + $0x150] sm:$0xff] %v2037_v11 }
 0x351   :  { %2352 = vst [vmem:[#allocation13 + $0x158] sm:$0xff] %v2086_v18 }
 0x352   :  { %v1938_v16 = vpop.f32.mrf.mxu2  ;;  %v1987_v47 = vpop.f32.mrf.mxu3 }
 0x353   :  { %v1939_v17 = vadd.f32 %v1938_v16, %v3715_v49  ;;  %v1988_v19 = vadd.f32 %v1987_v47, %v3718_v34 }
 0x355   :  { %2349 = vst [vmem:[#allocation13 + $0x140] sm:$0xff] %v1939_v17  ;;  %v2039_v61 = vpop.f32.mrf.mxu0  ;;  %v2088_v29 = vpop.f32.mrf.mxu1 }
 0x356   :  { %2350 = vst [vmem:[#allocation13 + $0x148] sm:$0xff] %v1988_v19  ;;  %v2040_v20 = vadd.f32 %v2039_v61, %v3705_v46  ;;  %v2089_v42 = vadd.f32 %v2088_v29, %v3708_v27 }
 0x357   :  { %2136 = vmatmul.bf16.gmra.mxu2 %v3664_v26  ;;  %2185 = vmatmul.bf16.gmra.mxu3 %v3664_v26 }
 0x358   :  { %2359 = vst [vmem:[#allocation13 + $0x190] sm:$0xff] %v2040_v20  ;;  %2234 = vmatmul.bf16.gmra.mxu0 %v3664_v26  ;;  %2283 = vmatmul.bf16.gmra.mxu1 %v3664_v26 }
 0x359   :  { %2360 = vst [vmem:[#allocation13 + $0x198] sm:$0xff] %v2089_v42 }
 0x35a   :  { %v1941_v24 = vpop.f32.mrf.mxu2  ;;  %v1990_v25 = vpop.f32.mrf.mxu3 }
 0x35b   :  { %v1942_v14 = vadd.f32 %v1941_v24, %v3715_v49  ;;  %v1991_v32 = vadd.f32 %v1990_v25, %v3718_v34 }
 0x35d   :  { %2357 = vst [vmem:[#allocation13 + $0x180] sm:$0xff] %v1942_v14  ;;  %v2041_v33 = vpop.f32.mrf.mxu0  ;;  %v2090_v41 = vpop.f32.mrf.mxu1 }
 0x35e   :  { %2358 = vst [vmem:[#allocation13 + $0x188] sm:$0xff] %v1991_v32  ;;  %v2042_v35 = vadd.f32 %v2041_v33, %v3705_v46  ;;  %v2091_v39 = vadd.f32 %v2090_v41, %v3708_v27 }
 0x360   :  { %2367 = vst [vmem:[#allocation13 + $0x1d0] sm:$0xff] %v2042_v35 }
 0x361   :  { %2368 = vst [vmem:[#allocation13 + $0x1d8] sm:$0xff] %v2091_v39 }
 0x362   :  { %v1943_v2 = vpop.f32.mrf.mxu2  ;;  %v1992_v57 = vpop.f32.mrf.mxu3 }
 0x363   :  { %v1944_v26 = vadd.f32 %v1943_v2, %v3715_v49  ;;  %v1993_v51 = vadd.f32 %v1992_v57, %v3718_v34 }
 0x365   :  { %2365 = vst [vmem:[#allocation13 + $0x1c0] sm:$0xff] %v1944_v26  ;;  %v2044_v53 = vpop.f32.mrf.mxu0  ;;  %v2093_v48 = vpop.f32.mrf.mxu1 }
 0x366   :  { %2366 = vst [vmem:[#allocation13 + $0x1c8] sm:$0xff] %v1993_v51  ;;  %v2045_v23 = vadd.f32 %v2044_v53, %v3705_v46  ;;  %v2094_v45 = vadd.f32 %v2093_v48, %v3708_v27 }
 0x367   :  { %2141 = vmatmul.bf16.gmra.mxu2 %v3672_v37  ;;  %2190 = vmatmul.bf16.gmra.mxu3 %v3672_v37 }
 0x368   :  { %2375 = vst [vmem:[#allocation13 + $0x210] sm:$0xff] %v2045_v23  ;;  %2239 = vmatmul.bf16.gmra.mxu0 %v3672_v37  ;;  %2288 = vmatmul.bf16.gmra.mxu1 %v3672_v37 }
 0x369   :  { %2376 = vst [vmem:[#allocation13 + $0x218] sm:$0xff] %v2094_v45 }
 0x36a   :  { %v1946_v58 = vpop.f32.mrf.mxu2  ;;  %v1995_v31 = vpop.f32.mrf.mxu3 }
 0x36b   :  { %v1947_v43 = vadd.f32 %v1946_v58, %v3715_v49  ;;  %v1996_v40 = vadd.f32 %v1995_v31, %v3718_v34  ;;  %v3814_v58 = vperm.slane %v3702_v44, 7 }
 0x36d   :  { %2373 = vst [vmem:[#allocation13 + $0x200] sm:$0xff] %v1947_v43  ;;  %v2046_v38 = vpop.f32.mrf.mxu0  ;;  %v2095_v4 = vpop.f32.mrf.mxu1 }
 0x36e   :  { %2374 = vst [vmem:[#allocation13 + $0x208] sm:$0xff] %v1996_v40  ;;  %v2047_v52 = vadd.f32 %v2046_v38, %v3705_v46  ;;  %v2096_v54 = vadd.f32 %v2095_v4, %v3708_v27  ;;  %v3821_v4 = vperm.slane %v3702_v44, 4 }
 0x370   :  { %2383 = vst [vmem:[#allocation13 + $0x250] sm:$0xff] %v2047_v52  ;;  %v3824_v52 = vperm.slane %v3702_v44, 5 }
 0x371   :  { %2384 = vst [vmem:[#allocation13 + $0x258] sm:$0xff] %v2096_v54 }
 0x372   :  { %v1948_v56 = vpop.f32.mrf.mxu2  ;;  %v1997_v59 = vpop.f32.mrf.mxu3 }
 0x373   :  { %v1949_v37 = vadd.f32 %v1948_v56, %v3715_v49  ;;  %v1998_v8 = vadd.f32 %v1997_v59, %v3718_v34 }
 0x375   :  { %2381 = vst [vmem:[#allocation13 + $0x240] sm:$0xff] %v1949_v37  ;;  %v2049_v62 = vpop.f32.mrf.mxu0  ;;  %v2098_v63 = vpop.f32.mrf.mxu1 }
 0x376   :  { %2382 = vst [vmem:[#allocation13 + $0x248] sm:$0xff] %v1998_v8  ;;  %v2050_v50 = vadd.f32 %v2049_v62, %v3705_v46  ;;  %v2099_v10 = vadd.f32 %v2098_v63, %v3708_v27 }
 0x377   :  { %2146 = vmatmul.bf16.gmra.mxu2 %v3680_v5  ;;  %2195 = vmatmul.bf16.gmra.mxu3 %v3680_v5 }
 0x378   :  { %2391 = vst [vmem:[#allocation13 + $0x290] sm:$0xff] %v2050_v50  ;;  %2244 = vmatmul.bf16.gmra.mxu0 %v3680_v5  ;;  %2293 = vmatmul.bf16.gmra.mxu1 %v3680_v5 }
 0x379   :  { %2392 = vst [vmem:[#allocation13 + $0x298] sm:$0xff] %v2099_v10 }
 0x37a   :  { %v1951_v55 = vpop.f32.mrf.mxu2  ;;  %v2000_v7 = vpop.f32.mrf.mxu3 }
 0x37b   :  { %v1952_v1 = vadd.f32 %v1951_v55, %v3715_v49  ;;  %v2001_v15 = vadd.f32 %v2000_v7, %v3718_v34 }
 0x37d   :  { %2389 = vst [vmem:[#allocation13 + $0x280] sm:$0xff] %v1952_v1  ;;  %v2051_v6 = vpop.f32.mrf.mxu0  ;;  %v2100_v0 = vpop.f32.mrf.mxu1 }
 0x37e   :  { %2390 = vst [vmem:[#allocation13 + $0x288] sm:$0xff] %v2001_v15  ;;  %v2052_v60 = vadd.f32 %v2051_v6, %v3705_v46  ;;  %v2101_v9 = vadd.f32 %v2100_v0, %v3708_v27 }
 0x380   :  { %2399 = vst [vmem:[#allocation13 + $0x2d0] sm:$0xff] %v2052_v60 }
 0x381   :  { %2400 = vst [vmem:[#allocation13 + $0x2d8] sm:$0xff] %v2101_v9 }
 0x382   :  { %v1953_v12 = vpop.f32.mrf.mxu2  ;;  %v2002_v22 = vpop.f32.mrf.mxu3 }
 0x383   :  { %v1954_v5 = vadd.f32 %v1953_v12, %v3715_v49  ;;  %v2003_v3 = vadd.f32 %v2002_v22, %v3718_v34 }
 0x385   :  { %2397 = vst [vmem:[#allocation13 + $0x2c0] sm:$0xff] %v1954_v5  ;;  %v2054_v30 = vpop.f32.mrf.mxu0  ;;  %v2103_v13 = vpop.f32.mrf.mxu1 }
 0x386   :  { %2398 = vst [vmem:[#allocation13 + $0x2c8] sm:$0xff] %v2003_v3  ;;  %v2055_v28 = vadd.f32 %v2054_v30, %v3705_v46  ;;  %v2104_v11 = vadd.f32 %v2103_v13, %v3708_v27 }
 0x387   :  { %2151 = vmatmul.bf16.gmra.mxu2 %v3688_v36  ;;  %2200 = vmatmul.bf16.gmra.mxu3 %v3688_v36 }
 0x388   :  { %2407 = vst [vmem:[#allocation13 + $0x310] sm:$0xff] %v2055_v28  ;;  %2249 = vmatmul.bf16.gmra.mxu0 %v3688_v36  ;;  %2298 = vmatmul.bf16.gmra.mxu1 %v3688_v36 }
 0x389   :  { %2408 = vst [vmem:[#allocation13 + $0x318] sm:$0xff] %v2104_v11 }
 0x38a   :  { %v1956_v18 = vpop.f32.mrf.mxu2  ;;  %v2005_v16 = vpop.f32.mrf.mxu3 }
 0x38b   :  { %v1957_v47 = vadd.f32 %v1956_v18, %v3715_v49  ;;  %v2006_v17 = vadd.f32 %v2005_v16, %v3718_v34 }
 0x38d   :  { %2405 = vst [vmem:[#allocation13 + $0x300] sm:$0xff] %v1957_v47  ;;  %v2056_v19 = vpop.f32.mrf.mxu0  ;;  %v2105_v61 = vpop.f32.mrf.mxu1 }
 0x38e   :  { %2406 = vst [vmem:[#allocation13 + $0x308] sm:$0xff] %v2006_v17  ;;  %v2057_v29 = vadd.f32 %v2056_v19, %v3705_v46  ;;  %v2106_v20 = vadd.f32 %v2105_v61, %v3708_v27 }
 0x390   :  { %2415 = vst [vmem:[#allocation13 + $0x350] sm:$0xff] %v2057_v29 }
 0x391   :  { %2416 = vst [vmem:[#allocation13 + $0x358] sm:$0xff] %v2106_v20 }
 0x392   :  { %v1958_v42 = vpop.f32.mrf.mxu2  ;;  %v2007_v24 = vpop.f32.mrf.mxu3 }
 0x393   :  { %v1959_v36 = vadd.f32 %v1958_v42, %v3715_v49  ;;  %v2008_v25 = vadd.f32 %v2007_v24, %v3718_v34 }
 0x395   :  { %2413 = vst [vmem:[#allocation13 + $0x340] sm:$0xff] %v1959_v36  ;;  %v2059_v14 = vpop.f32.mrf.mxu0  ;;  %v2108_v32 = vpop.f32.mrf.mxu1 }
 0x396   :  { %2414 = vst [vmem:[#allocation13 + $0x348] sm:$0xff] %v2008_v25  ;;  %v2060_v33 = vadd.f32 %v2059_v14, %v3705_v46  ;;  %v2109_v41 = vadd.f32 %v2108_v32, %v3708_v27 }
 0x397   :  { %2156 = vmatmul.bf16.gmra.mxu2 %v3696_v21  ;;  %2205 = vmatmul.bf16.gmra.mxu3 %v3696_v21 }
 0x398   :  { %2423 = vst [vmem:[#allocation13 + $0x390] sm:$0xff] %v2060_v33  ;;  %2254 = vmatmul.bf16.gmra.mxu0 %v3696_v21  ;;  %2303 = vmatmul.bf16.gmra.mxu1 %v3696_v21  ;;  %v3811_v21 = vperm.slane %v3702_v44, 6 }
 0x399   :  { %2424 = vst [vmem:[#allocation13 + $0x398] sm:$0xff] %v2109_v41 }
 0x39a   :  { %v1961_v35 = vpop.f32.mrf.mxu2  ;;  %v2010_v39 = vpop.f32.mrf.mxu3 }
 0x39b   :  { %v1962_v2 = vadd.f32 %v1961_v35, %v3715_v49  ;;  %v2011_v57 = vadd.f32 %v2010_v39, %v3718_v34 }
 0x39d   :  { %2421 = vst [vmem:[#allocation13 + $0x380] sm:$0xff] %v1962_v2  ;;  %v2061_v26 = vpop.f32.mrf.mxu0  ;;  %v2110_v51 = vpop.f32.mrf.mxu1 }
 0x39e   :  { %2422 = vst [vmem:[#allocation13 + $0x388] sm:$0xff] %v2011_v57  ;;  %v2062_v53 = vadd.f32 %v2061_v26, %v3705_v46  ;;  %v2111_v48 = vadd.f32 %v2110_v51, %v3708_v27 }
 0x3a0   :  { %2431 = vst [vmem:[#allocation13 + $0x3d0] sm:$0xff] %v2062_v53 }
 0x3a1   :  { %2432 = vst [vmem:[#allocation13 + $0x3d8] sm:$0xff] %v2111_v48 }
 0x3a2   :  { %v1963_v23 = vpop.f32.mrf.mxu2  ;;  %v2012_v45 = vpop.f32.mrf.mxu3 }
 0x3a3   :  { %v1964_v31 = vadd.f32 %v1963_v23, %v3715_v49  ;;  %v2013_v43 = vadd.f32 %v2012_v45, %v3718_v34 }
 0x3a5   :  { %2429 = vst [vmem:[#allocation13 + $0x3c0] sm:$0xff] %v1964_v31  ;;  %v2220_v40 = vpop.f32.mrf.mxu0  ;;  %v2269_v38 = vpop.f32.mrf.mxu1 }
 0x3a6   :  { %2430 = vst [vmem:[#allocation13 + $0x3c8] sm:$0xff] %v2013_v43  ;;  %v2221_v46 = vadd.f32 %v2220_v40, %v3811_v21  ;;  %v2270_v27 = vadd.f32 %v2269_v38, %v3814_v58 }
 0x3a8   :  { %2315 = vst [vmem:[#allocation13 + $0x30] sm:$0xff] %v2221_v46 }
 0x3a9   :  { %2316 = vst [vmem:[#allocation13 + $0x38] sm:$0xff] %v2270_v27 }
 0x3aa   :  { %v2122_v54 = vpop.f32.mrf.mxu2  ;;  %v2171_v49 = vpop.f32.mrf.mxu3 }
 0x3ab   :  { %v2123_v34 = vadd.f32 %v2122_v54, %v3821_v4  ;;  %v2172_v56 = vadd.f32 %v2171_v49, %v3824_v52 }
 0x3ad   :  { %2313 = vst [vmem:[#allocation13 + $0x20] sm:$0xff] %v2123_v34  ;;  %v2222_v59 = vpop.f32.mrf.mxu0  ;;  %v2271_v37 = vpop.f32.mrf.mxu1 }
 0x3ae   :  { %2314 = vst [vmem:[#allocation13 + $0x28] sm:$0xff] %v2172_v56  ;;  %v2223_v8 = vadd.f32 %v2222_v59, %v3811_v21  ;;  %v2272_v62 = vadd.f32 %v2271_v37, %v3814_v58 }
 0x3b0   :  { %2323 = vst [vmem:[#allocation13 + $0x70] sm:$0xff] %v2223_v8 }
 0x3b1   :  { %2324 = vst [vmem:[#allocation13 + $0x78] sm:$0xff] %v2272_v62 }
 0x3b2   :  { %v2124_v44 = vpop.f32.mrf.mxu2  ;;  %v2173_v63 = vpop.f32.mrf.mxu3 }
 0x3b3   :  { %v2125_v50 = vadd.f32 %v2124_v44, %v3821_v4  ;;  %v2174_v10 = vadd.f32 %v2173_v63, %v3824_v52 }
 0x3b5   :  { %2321 = vst [vmem:[#allocation13 + $0x60] sm:$0xff] %v2125_v50  ;;  %v2225_v55 = vpop.f32.mrf.mxu0  ;;  %v2274_v7 = vpop.f32.mrf.mxu1 }
 0x3b6   :  { %2322 = vst [vmem:[#allocation13 + $0x68] sm:$0xff] %v2174_v10  ;;  %v2226_v1 = vadd.f32 %v2225_v55, %v3811_v21  ;;  %v2275_v15 = vadd.f32 %v2274_v7, %v3814_v58 }
 0x3b8   :  { %2331 = vst [vmem:[#allocation13 + $0xb0] sm:$0xff] %v2226_v1 }
 0x3b9   :  { %2332 = vst [vmem:[#allocation13 + $0xb8] sm:$0xff] %v2275_v15 }
 0x3ba   :  { %v2127_v6 = vpop.f32.mrf.mxu2  ;;  %v2176_v0 = vpop.f32.mrf.mxu3 }
 0x3bb   :  { %v2128_v60 = vadd.f32 %v2127_v6, %v3821_v4  ;;  %v2177_v9 = vadd.f32 %v2176_v0, %v3824_v52 }
 0x3bd   :  { %2329 = vst [vmem:[#allocation13 + $0xa0] sm:$0xff] %v2128_v60  ;;  %v2227_v12 = vpop.f32.mrf.mxu0  ;;  %v2276_v22 = vpop.f32.mrf.mxu1 }
 0x3be   :  { %2330 = vst [vmem:[#allocation13 + $0xa8] sm:$0xff] %v2177_v9  ;;  %v2228_v5 = vadd.f32 %v2227_v12, %v3811_v21  ;;  %v2277_v3 = vadd.f32 %v2276_v22, %v3814_v58 }
 0x3c0   :  { %2339 = vst [vmem:[#allocation13 + $0xf0] sm:$0xff] %v2228_v5 }
 0x3c1   :  { %2340 = vst [vmem:[#allocation13 + $0xf8] sm:$0xff] %v2277_v3 }
 0x3c2   :  { %v2129_v30 = vpop.f32.mrf.mxu2  ;;  %v2178_v13 = vpop.f32.mrf.mxu3 }
 0x3c3   :  { %v2130_v28 = vadd.f32 %v2129_v30, %v3821_v4  ;;  %v2179_v11 = vadd.f32 %v2178_v13, %v3824_v52 }
 0x3c5   :  { %2337 = vst [vmem:[#allocation13 + $0xe0] sm:$0xff] %v2130_v28  ;;  %v2230_v18 = vpop.f32.mrf.mxu0  ;;  %v2279_v16 = vpop.f32.mrf.mxu1 }
 0x3c6   :  { %2338 = vst [vmem:[#allocation13 + $0xe8] sm:$0xff] %v2179_v11  ;;  %v2231_v47 = vadd.f32 %v2230_v18, %v3811_v21  ;;  %v2280_v17 = vadd.f32 %v2279_v16, %v3814_v58 }
 0x3c8   :  { %2347 = vst [vmem:[#allocation13 + $0x130] sm:$0xff] %v2231_v47 }
 0x3c9   :  { %2348 = vst [vmem:[#allocation13 + $0x138] sm:$0xff] %v2280_v17 }
 0x3ca   :  { %v2132_v19 = vpop.f32.mrf.mxu2  ;;  %v2181_v61 = vpop.f32.mrf.mxu3 }
 0x3cb   :  { %v2133_v29 = vadd.f32 %v2132_v19, %v3821_v4  ;;  %v2182_v20 = vadd.f32 %v2181_v61, %v3824_v52 }
 0x3cd   :  { %2345 = vst [vmem:[#allocation13 + $0x120] sm:$0xff] %v2133_v29  ;;  %v2232_v42 = vpop.f32.mrf.mxu0  ;;  %v2281_v24 = vpop.f32.mrf.mxu1 }
 0x3ce   :  { %2346 = vst [vmem:[#allocation13 + $0x128] sm:$0xff] %v2182_v20  ;;  %v2233_v36 = vadd.f32 %v2232_v42, %v3811_v21  ;;  %v2282_v25 = vadd.f32 %v2281_v24, %v3814_v58 }
 0x3d0   :  { %2355 = vst [vmem:[#allocation13 + $0x170] sm:$0xff] %v2233_v36 }
 0x3d1   :  { %2356 = vst [vmem:[#allocation13 + $0x178] sm:$0xff] %v2282_v25 }
 0x3d2   :  { %v2134_v14 = vpop.f32.mrf.mxu2  ;;  %v2183_v32 = vpop.f32.mrf.mxu3 }
 0x3d3   :  { %v2135_v33 = vadd.f32 %v2134_v14, %v3821_v4  ;;  %v2184_v41 = vadd.f32 %v2183_v32, %v3824_v52 }
 0x3d5   :  { %2353 = vst [vmem:[#allocation13 + $0x160] sm:$0xff] %v2135_v33  ;;  %v2235_v35 = vpop.f32.mrf.mxu0  ;;  %v2284_v39 = vpop.f32.mrf.mxu1 }
 0x3d6   :  { %2354 = vst [vmem:[#allocation13 + $0x168] sm:$0xff] %v2184_v41  ;;  %v2236_v2 = vadd.f32 %v2235_v35, %v3811_v21  ;;  %v2285_v57 = vadd.f32 %v2284_v39, %v3814_v58 }
 0x3d8   :  { %2363 = vst [vmem:[#allocation13 + $0x1b0] sm:$0xff] %v2236_v2 }
 0x3d9   :  { %2364 = vst [vmem:[#allocation13 + $0x1b8] sm:$0xff] %v2285_v57 }
 0x3da   :  { %v2137_v26 = vpop.f32.mrf.mxu2  ;;  %v2186_v51 = vpop.f32.mrf.mxu3 }
 0x3db   :  { %v2138_v53 = vadd.f32 %v2137_v26, %v3821_v4  ;;  %v2187_v48 = vadd.f32 %v2186_v51, %v3824_v52 }
 0x3dd   :  { %2361 = vst [vmem:[#allocation13 + $0x1a0] sm:$0xff] %v2138_v53  ;;  %v2237_v23 = vpop.f32.mrf.mxu0  ;;  %v2286_v45 = vpop.f32.mrf.mxu1 }
 0x3de   :  { %2362 = vst [vmem:[#allocation13 + $0x1a8] sm:$0xff] %v2187_v48  ;;  %v2238_v31 = vadd.f32 %v2237_v23, %v3811_v21  ;;  %v2287_v43 = vadd.f32 %v2286_v45, %v3814_v58 }
 0x3e0   :  { %2371 = vst [vmem:[#allocation13 + $0x1f0] sm:$0xff] %v2238_v31 }
 0x3e1   :  { %2372 = vst [vmem:[#allocation13 + $0x1f8] sm:$0xff] %v2287_v43 }
 0x3e2   :  { %v2139_v40 = vpop.f32.mrf.mxu2  ;;  %v2188_v38 = vpop.f32.mrf.mxu3 }
 0x3e3   :  { %v2140_v46 = vadd.f32 %v2139_v40, %v3821_v4  ;;  %v2189_v27 = vadd.f32 %v2188_v38, %v3824_v52 }
 0x3e5   :  { %2369 = vst [vmem:[#allocation13 + $0x1e0] sm:$0xff] %v2140_v46  ;;  %v2240_v54 = vpop.f32.mrf.mxu0  ;;  %v2289_v49 = vpop.f32.mrf.mxu1 }
 0x3e6   :  { %2370 = vst [vmem:[#allocation13 + $0x1e8] sm:$0xff] %v2189_v27  ;;  %v2241_v34 = vadd.f32 %v2240_v54, %v3811_v21  ;;  %v2290_v56 = vadd.f32 %v2289_v49, %v3814_v58 }
 0x3e8   :  { %2379 = vst [vmem:[#allocation13 + $0x230] sm:$0xff] %v2241_v34 }
 0x3e9   :  { %2380 = vst [vmem:[#allocation13 + $0x238] sm:$0xff] %v2290_v56 }
 0x3ea   :  { %v2142_v59 = vpop.f32.mrf.mxu2  ;;  %v2191_v37 = vpop.f32.mrf.mxu3 }
 0x3eb   :  { %v2143_v8 = vadd.f32 %v2142_v59, %v3821_v4  ;;  %v2192_v62 = vadd.f32 %v2191_v37, %v3824_v52 }
 0x3ed   :  { %2377 = vst [vmem:[#allocation13 + $0x220] sm:$0xff] %v2143_v8  ;;  %v2242_v44 = vpop.f32.mrf.mxu0  ;;  %v2291_v63 = vpop.f32.mrf.mxu1 }
 0x3ee   :  { %2378 = vst [vmem:[#allocation13 + $0x228] sm:$0xff] %v2192_v62  ;;  %v2243_v50 = vadd.f32 %v2242_v44, %v3811_v21  ;;  %v2292_v10 = vadd.f32 %v2291_v63, %v3814_v58 }
 0x3f0   :  { %2387 = vst [vmem:[#allocation13 + $0x270] sm:$0xff] %v2243_v50 }
 0x3f1   :  { %2388 = vst [vmem:[#allocation13 + $0x278] sm:$0xff] %v2292_v10 }
 0x3f2   :  { %v2144_v55 = vpop.f32.mrf.mxu2  ;;  %v2193_v7 = vpop.f32.mrf.mxu3 }
 0x3f3   :  { %v2145_v1 = vadd.f32 %v2144_v55, %v3821_v4  ;;  %v2194_v15 = vadd.f32 %v2193_v7, %v3824_v52 }
 0x3f5   :  { %2385 = vst [vmem:[#allocation13 + $0x260] sm:$0xff] %v2145_v1  ;;  %v2245_v6 = vpop.f32.mrf.mxu0  ;;  %v2294_v0 = vpop.f32.mrf.mxu1 }
 0x3f6   :  { %2386 = vst [vmem:[#allocation13 + $0x268] sm:$0xff] %v2194_v15  ;;  %v2246_v60 = vadd.f32 %v2245_v6, %v3811_v21  ;;  %v2295_v9 = vadd.f32 %v2294_v0, %v3814_v58 }
 0x3f8   :  { %2395 = vst [vmem:[#allocation13 + $0x2b0] sm:$0xff] %v2246_v60 }
 0x3f9   :  { %2396 = vst [vmem:[#allocation13 + $0x2b8] sm:$0xff] %v2295_v9 }
 0x3fa   :  { %v2147_v12 = vpop.f32.mrf.mxu2  ;;  %v2196_v22 = vpop.f32.mrf.mxu3 }
 0x3fb   :  { %v2148_v5 = vadd.f32 %v2147_v12, %v3821_v4  ;;  %v2197_v3 = vadd.f32 %v2196_v22, %v3824_v52 }
 0x3fd   :  { %2393 = vst [vmem:[#allocation13 + $0x2a0] sm:$0xff] %v2148_v5  ;;  %v2247_v30 = vpop.f32.mrf.mxu0  ;;  %v2296_v13 = vpop.f32.mrf.mxu1 }
 0x3fe   :  { %2394 = vst [vmem:[#allocation13 + $0x2a8] sm:$0xff] %v2197_v3  ;;  %v2248_v28 = vadd.f32 %v2247_v30, %v3811_v21  ;;  %v2297_v11 = vadd.f32 %v2296_v13, %v3814_v58 }
 0x400   :  { %2403 = vst [vmem:[#allocation13 + $0x2f0] sm:$0xff] %v2248_v28 }
 0x401   :  { %2404 = vst [vmem:[#allocation13 + $0x2f8] sm:$0xff] %v2297_v11 }
 0x402   :  { %v2149_v18 = vpop.f32.mrf.mxu2  ;;  %v2198_v16 = vpop.f32.mrf.mxu3 }
 0x403   :  { %v2150_v47 = vadd.f32 %v2149_v18, %v3821_v4  ;;  %v2199_v17 = vadd.f32 %v2198_v16, %v3824_v52 }
 0x405   :  { %2401 = vst [vmem:[#allocation13 + $0x2e0] sm:$0xff] %v2150_v47  ;;  %v2250_v19 = vpop.f32.mrf.mxu0  ;;  %v2299_v61 = vpop.f32.mrf.mxu1 }
 0x406   :  { %2402 = vst [vmem:[#allocation13 + $0x2e8] sm:$0xff] %v2199_v17  ;;  %v2251_v29 = vadd.f32 %v2250_v19, %v3811_v21  ;;  %v2300_v20 = vadd.f32 %v2299_v61, %v3814_v58 }
 0x408   :  { %2411 = vst [vmem:[#allocation13 + $0x330] sm:$0xff] %v2251_v29 }
 0x409   :  { %2412 = vst [vmem:[#allocation13 + $0x338] sm:$0xff] %v2300_v20 }
 0x40a   :  { %v2152_v42 = vpop.f32.mrf.mxu2  ;;  %v2201_v24 = vpop.f32.mrf.mxu3 }
 0x40b   :  { %v2153_v36 = vadd.f32 %v2152_v42, %v3821_v4  ;;  %v2202_v25 = vadd.f32 %v2201_v24, %v3824_v52 }
 0x40d   :  { %2409 = vst [vmem:[#allocation13 + $0x320] sm:$0xff] %v2153_v36  ;;  %v2252_v14 = vpop.f32.mrf.mxu0  ;;  %v2301_v32 = vpop.f32.mrf.mxu1 }
 0x40e   :  { %2410 = vst [vmem:[#allocation13 + $0x328] sm:$0xff] %v2202_v25  ;;  %v2253_v33 = vadd.f32 %v2252_v14, %v3811_v21  ;;  %v2302_v41 = vadd.f32 %v2301_v32, %v3814_v58 }
 0x410   :  { %2419 = vst [vmem:[#allocation13 + $0x370] sm:$0xff] %v2253_v33 }
 0x411   :  { %2420 = vst [vmem:[#allocation13 + $0x378] sm:$0xff] %v2302_v41 }
 0x412   :  { %v2154_v35 = vpop.f32.mrf.mxu2  ;;  %v2203_v39 = vpop.f32.mrf.mxu3 }
 0x413   :  { %v2155_v2 = vadd.f32 %v2154_v35, %v3821_v4  ;;  %v2204_v57 = vadd.f32 %v2203_v39, %v3824_v52 }
 0x415   :  { %2417 = vst [vmem:[#allocation13 + $0x360] sm:$0xff] %v2155_v2  ;;  %v2255_v26 = vpop.f32.mrf.mxu0  ;;  %v2304_v51 = vpop.f32.mrf.mxu1 }
 0x416   :  { %2418 = vst [vmem:[#allocation13 + $0x368] sm:$0xff] %v2204_v57  ;;  %v2256_v53 = vadd.f32 %v2255_v26, %v3811_v21  ;;  %v2305_v48 = vadd.f32 %v2304_v51, %v3814_v58 }
 0x418   :  { %2427 = vst [vmem:[#allocation13 + $0x3b0] sm:$0xff] %v2256_v53 }
 0x419   :  { %2428 = vst [vmem:[#allocation13 + $0x3b8] sm:$0xff] %v2305_v48 }
 0x41a   :  { %v2157_v23 = vpop.f32.mrf.mxu2  ;;  %v2206_v45 = vpop.f32.mrf.mxu3 }
 0x41b   :  { %v2158_v31 = vadd.f32 %v2157_v23, %v3821_v4  ;;  %v2207_v43 = vadd.f32 %v2206_v45, %v3824_v52 }
 0x41d   :  { %2425 = vst [vmem:[#allocation13 + $0x3a0] sm:$0xff] %v2158_v31  ;;  %v2257_v40 = vpop.f32.mrf.mxu0  ;;  %v2306_v38 = vpop.f32.mrf.mxu1 }
 0x41e   :  { %2426 = vst [vmem:[#allocation13 + $0x3a8] sm:$0xff] %v2207_v43  ;;  %v2258_v46 = vadd.f32 %v2257_v40, %v3811_v21  ;;  %v2307_v27 = vadd.f32 %v2306_v38, %v3814_v58 }
 0x420   :  { %2435 = vst [vmem:[#allocation13 + $0x3f0] sm:$0xff] %v2258_v46 }
 0x421   :  { %2436 = vst [vmem:[#allocation13 + $0x3f8] sm:$0xff] %v2307_v27 }
 0x422   :  { %v2159_v54 = vpop.f32.mrf.mxu2  ;;  %v2208_v49 = vpop.f32.mrf.mxu3 }
 0x423   :  { %v2160_v34 = vadd.f32 %v2159_v54, %v3821_v4  ;;  %v2209_v56 = vadd.f32 %v2208_v49, %v3824_v52 }
 0x425   :  { %2433 = vst [vmem:[#allocation13 + $0x3e0] sm:$0xff] %v2160_v34 }
 0x426   :  { %2434 = vst [vmem:[#allocation13 + $0x3e8] sm:$0xff] %v2209_v56 }
 0x427   :  { %2449 = dma.vmem_to_hbm [thread:$0]  %s2442_s22, 16384, %s2444_s24, [#allocation4], %s3393_s27, %s3393_s27, %s3389_s17  }
 0x428   :  { %3386 = dma.done.wait [#allocation4], 16384  }
 0x429   :  { %3387 = vsyncadd [#allocation4], 4294950912 }
 0x42a   :  { %2454 = vsyncpa [#allocation3], 1 }
 0x42b   :  { %2455 = vsyncpa [#allocation6], 1 }
 0x42c   :  { %2456 = vsyncpa [#allocation9], 1 }
 0x42d   :  { %2457 = vsyncpa [#allocation12], 1 }
 0x42e   :  { %2458 = vsyncpa [#allocation4], 1 }

</bundles_post_ra>
